<compile_context>
chip_gen: v6e
topology: v6e:2x2x1
jax: 0.10.0
libtpu: 0.0.40
codegen_flags: <defaults>
</compile_context>

<pallas_src>
import functools

import jax
import jax.numpy as jnp
from jax.experimental import pallas as pl
from jax.experimental.pallas import tpu as pltpu

HIDDEN = 50   # hidden_size fixed by the PyTorch module
HP = 128      # per-gate hidden padded to one full 128-lane vreg block
NG = 4        # LSTM gates: i, f, g, o (PyTorch ordering)
BP = 8        # batch padded to one full sublane tile
VP = 128      # output vocab padded to one full lane tile (lane-dense store)


def _lstm_kernel(seq, x_ref, wih_ref, whh_ref, b_ref, wout_ref,
                 y_ref, gx_sc, hh_sc):
    """Full LSTM recurrence + output projection in one pallas_call.

    x_ref    : (seq*BP, vocab)   time-major, batch padded to BP        VMEM
    wih_ref  : (vocab, 4*HP)     W_ih^T, each gate in its own 128-lane block
    whh_ref  : (HP, 4*HP)        W_hh^T, zero-padded rows/cols
    b_ref    : (1, 4*HP)         b_ih + b_hh, gate-padded
    wout_ref : (HP, VP)          W_out^T, zero-padded rows/cols (lane-dense)
    y_ref    : (seq*BP, VP)      output                                VMEM
    gx_sc    : (seq, BP, 4*HP)   scratch: precomputed input gates
    hh_sc    : (seq, BP, HP)     scratch: per-step hidden states

    Padded-lane invariant: padded gate lanes see zero weights and zero bias,
    so gates there are 0 -> sigmoid(0)=0.5 / tanh(0)=0; since c and h start at
    zero, padded lanes of c and h stay exactly zero every step (this would
    break if a nonzero initial (h, c) were ever fed in).
    """
    # ---- 1) Input projection hoisted out of the recurrence: one big
    #         lane-dense matmul with the bias broadcast fused in (done once).
    gx_sc[...] = (
        jnp.dot(x_ref[...], wih_ref[...], preferred_element_type=jnp.float32)
        + b_ref[...]
    ).reshape(seq, BP, NG * HP)

    # ---- 2) Serial recurrence, fully unrolled (seq is small & static).
    #         Per step: one (BP, HP) @ (HP, 4*HP) matmul + elementwise.
    #         gx_sc[t] / hh_sc[t] are full (8, .) tiles -> unmasked vld/vst;
    #         gate slices are 128-lane aligned -> free vreg selections.
    h = jnp.zeros((BP, HP), jnp.float32)
    c = jnp.zeros((BP, HP), jnp.float32)
    for t in range(seq):
        gates = gx_sc[t] + jnp.dot(h, whh_ref[...],
                                   preferred_element_type=jnp.float32)
        i_g = jax.nn.sigmoid(gates[:, 0 * HP:1 * HP])
        f_g = jax.nn.sigmoid(gates[:, 1 * HP:2 * HP])
        g_g = jnp.tanh(gates[:, 2 * HP:3 * HP])
        o_g = jax.nn.sigmoid(gates[:, 3 * HP:4 * HP])
        c = f_g * c + i_g * g_g
        h = o_g * jnp.tanh(c)
        hh_sc[t] = h

    # ---- 3) Output projection hoisted out of the loop: one matmul and a
    #         single lane-dense slab store (no per-step 32-lane partial stores).
    y_ref[...] = jnp.dot(hh_sc[...].reshape(seq * BP, HP), wout_ref[...],
                         preferred_element_type=jnp.float32)


def _pad_gate_cols(w, h):
    """(K, 4*h) -> (K, 4*HP): move each gate's h columns into its own
    128-lane block; zero elsewhere."""
    k_dim = w.shape[0]
    out = jnp.zeros((k_dim, NG * HP), jnp.float32)
    for g in range(NG):
        out = out.at[:, g * HP:g * HP + h].set(w[:, g * h:(g + 1) * h])
    return out


def pack_lstm_params(w_ih, w_hh, b_ih, b_hh, w_out):
    """One-time repack of PyTorch-layout LSTM params into lane/sublane-aligned
    layouts. Call ONCE at init and reuse; keep out of the per-call jit path.

    w_ih : (4H, vocab), w_hh : (4H, H), b_ih/b_hh : (4H,), w_out : (vocab, H)
    """
    H = HIDDEN
    vocab = w_ih.shape[1]
    wih_p = _pad_gate_cols(jnp.transpose(w_ih).astype(jnp.float32), H)       # (vocab, 512)
    whh_p = jnp.zeros((HP, NG * HP), jnp.float32).at[:H, :].set(
        _pad_gate_cols(jnp.transpose(w_hh).astype(jnp.float32), H))          # (128, 512)
    b_p = _pad_gate_cols(
        (b_ih + b_hh).reshape(1, NG * H).astype(jnp.float32), H)             # (1, 512)
    wout_p = jnp.zeros((HP, VP), jnp.float32).at[:H, :vocab].set(
        jnp.transpose(w_out).astype(jnp.float32))                            # (128, 128)
    return wih_p, whh_p, b_p, wout_p


@jax.jit
def simple_lstm_net(x, wih_p, whh_p, b_p, wout_p):
    """Forward pass equivalent to SimpleLSTMNet.forward.

    x : (seq, batch, vocab) float32 (time-major, PyTorch nn.LSTM default)
    wih_p/whh_p/b_p/wout_p : padded params from pack_lstm_params()
    returns (seq*batch, vocab) float32
    """
    seq, batch, vocab = x.shape

    # Pad the batch to a full sublane tile (BP=8). Padded rows see zero input;
    # they evolve independently and are sliced away below.
    xp = jnp.zeros((seq, BP, vocab), jnp.float32).at[:, :batch, :].set(
        x.astype(jnp.float32))
    x2 = xp.reshape(seq * BP, vocab)

    full = lambda shape: pl.BlockSpec(shape, lambda i: (0,) * len(shape))

    flops = (2 * seq * BP * vocab * NG * HP          # input projection
             + 2 * seq * BP * HP * NG * HP           # recurrence matmuls
             + 2 * seq * BP * HP * VP)               # output projection
    transcendentals = 5 * seq * BP * HP
    bytes_accessed = 4 * (x2.size + seq * BP * VP + wih_p.size
                          + whh_p.size + b_p.size + wout_p.size)

    y = pl.pallas_call(
        functools.partial(_lstm_kernel, seq),
        out_shape=jax.ShapeDtypeStruct((seq * BP, VP), jnp.float32),
        grid_spec=pltpu.PrefetchScalarGridSpec(
            num_scalar_prefetch=0,
            grid=(1,),
            in_specs=[
                full((seq * BP, vocab)),
                full((vocab, NG * HP)),
                full((HP, NG * HP)),
                full((1, NG * HP)),
                full((HP, VP)),
            ],
            out_specs=full((seq * BP, VP)),
            scratch_shapes=[
                pltpu.VMEM((seq, BP, NG * HP), jnp.float32),  # input gates
                pltpu.VMEM((seq, BP, HP), jnp.float32),       # h history
            ],
        ),
        compiler_params=pltpu.CompilerParams(
            dimension_semantics=("arbitrary",)),
        cost_estimate=pl.CostEstimate(
            flops=flops, transcendentals=transcendentals,
            bytes_accessed=bytes_accessed),
    )(x2, wih_p, whh_p, b_p, wout_p)

    # Un-pad: (seq*BP, VP) -> (seq*batch, vocab), matching PyTorch's
    # x.view(-1, hidden) row ordering (time-major).
    return y.reshape(seq, BP, VP)[:, :batch, :vocab].reshape(seq * batch, vocab)


def _reference(x, w_ih, w_hh, b_ih, b_hh, w_out):
    """Pure-JAX reference for correctness checking."""
    seq, batch, vocab = x.shape
    H = HIDDEN
    h = jnp.zeros((batch, H), jnp.float32)
    c = jnp.zeros((batch, H), jnp.float32)
    outs = []
    for t in range(seq):
        gates = x[t] @ w_ih.T + h @ w_hh.T + b_ih + b_hh
        i = jax.nn.sigmoid(gates[:, 0 * H:1 * H])
        f = jax.nn.sigmoid(gates[:, 1 * H:2 * H])
        g = jnp.tanh(gates[:, 2 * H:3 * H])
        o = jax.nn.sigmoid(gates[:, 3 * H:4 * H])
        c = f * c + i * g
        h = o * jnp.tanh(c)
        outs.append(h)
    hs = jnp.stack(outs, axis=0).reshape(seq * batch, H)
    return hs @ w_out.T


if __name__ == "__main__":
    vocab_size = 32
    seq, batch = 8, 2
    H = HIDDEN

    key = jax.random.PRNGKey(0)
    ks = jax.random.split(key, 6)
    scale = 1.0 / jnp.sqrt(H)  # PyTorch-style uniform(-1/sqrt(H), 1/sqrt(H))

    x = jax.random.normal(ks[0], (seq, batch, vocab_size), jnp.float32)
    w_ih = jax.random.uniform(ks[1], (4 * H, vocab_size), jnp.float32, -scale, scale)
    w_hh = jax.random.uniform(ks[2], (4 * H, H), jnp.float32, -scale, scale)
    b_ih = jax.random.uniform(ks[3], (4 * H,), jnp.float32, -scale, scale)
    b_hh = jax.random.uniform(ks[4], (4 * H,), jnp.float32, -scale, scale)
    w_out = jax.random.uniform(ks[5], (vocab_size, H), jnp.float32, -scale, scale)

    # Pack parameters ONCE (outside the jitted per-call path).
    packed = pack_lstm_params(w_ih, w_hh, b_ih, b_hh, w_out)
    packed = jax.block_until_ready(packed)

    out = jax.block_until_ready(simple_lstm_net(x, *packed))

    ref = _reference(x, w_ih, w_hh, b_ih, b_hh, w_out)
    assert out.shape == (seq * batch, vocab_size), out.shape
    assert jnp.allclose(out, ref, atol=1e-4, rtol=1e-4), "mismatch vs reference"

    print("KERNEL_OK")
</pallas_src>

<mosaic_0001>
module attributes {stable_mosaic.version = 11 : i64} {
  func.func @_lstm_kernel(%arg0: i32, %arg1: memref<64x32xf32, #tpu.memory_space<vmem>>, %arg2: memref<32x512xf32, #tpu.memory_space<vmem>>, %arg3: memref<128x512xf32, #tpu.memory_space<vmem>>, %arg4: memref<1x512xf32, #tpu.memory_space<vmem>>, %arg5: memref<128x128xf32, #tpu.memory_space<vmem>>, %arg6: memref<64x128xf32, #tpu.memory_space<vmem>>, %arg7: memref<8x8x512xf32, #tpu.memory_space<vmem>>, %arg8: memref<8x8x128xf32, #tpu.memory_space<vmem>>) attributes {dimension_semantics = [#tpu.dimension_semantics<arbitrary>], iteration_bounds = array<i64: 1>, scalar_prefetch = 0 : i64, scratch_operands = 2 : i64, tpu.core_type = #tpu.core_type<tc>, window_params = [{pipeline_mode = #tpu.pipeline_mode<synchronous>, transform_indices = @transform_0, window_bounds = array<i64: 64, 32>}, {pipeline_mode = #tpu.pipeline_mode<synchronous>, transform_indices = @transform_1, window_bounds = array<i64: 32, 512>}, {pipeline_mode = #tpu.pipeline_mode<synchronous>, transform_indices = @transform_2, window_bounds = array<i64: 128, 512>}, {pipeline_mode = #tpu.pipeline_mode<synchronous>, transform_indices = @transform_3, window_bounds = array<i64: 1, 512>}, {pipeline_mode = #tpu.pipeline_mode<synchronous>, transform_indices = @transform_4, window_bounds = array<i64: 128, 128>}, {pipeline_mode = #tpu.pipeline_mode<synchronous>, transform_indices = @transform_5, window_bounds = array<i64: 64, 128>}]} {
    %c0 = arith.constant 0 : index
    %c0_0 = arith.constant 0 : index
    %0 = vector.load %arg1[%c0, %c0_0] : memref<64x32xf32, #tpu.memory_space<vmem>>, vector<64x32xf32>
    %c0_1 = arith.constant 0 : index
    %c0_2 = arith.constant 0 : index
    %1 = vector.load %arg2[%c0_1, %c0_2] : memref<32x512xf32, #tpu.memory_space<vmem>>, vector<32x512xf32>
    %cst = arith.constant dense<0.000000e+00> : vector<64x512xf32>
    %2 = tpu.matmul %0, %1, %cst {dimension_numbers = #tpu.dot_dimension_numbers<[1], [0], [0], [1], [0, 0, 1, 1], [], []>} : vector<64x32xf32>, vector<32x512xf32>, vector<64x512xf32> -> vector<64x512xf32>
    %c0_3 = arith.constant 0 : index
    %c0_4 = arith.constant 0 : index
    %3 = vector.load %arg4[%c0_3, %c0_4] : memref<1x512xf32, #tpu.memory_space<vmem>>, vector<1x512xf32>
    %4 = vector.broadcast %3 : vector<1x512xf32> to vector<64x512xf32>
    %5 = arith.addf %2, %4 : vector<64x512xf32>
    %6 = vector.shape_cast %5 : vector<64x512xf32> to vector<8x8x512xf32>
    %c0_5 = arith.constant 0 : index
    %c0_6 = arith.constant 0 : index
    %c0_7 = arith.constant 0 : index
    %7 = vector.load %arg7[%c0_5, %c0_6, %c0_7] : memref<8x8x512xf32, #tpu.memory_space<vmem>>, vector<8x8x512xf32>
    tpu.vector_store %arg7[%c0_5, %c0_6, %c0_7], %6 {strides = array<i32>} : memref<8x8x512xf32, #tpu.memory_space<vmem>>, vector<8x8x512xf32>,
    %cst_8 = arith.constant 0.000000e+00 : f32
    %8 = vector.broadcast %cst_8 : f32 to vector<8x128xf32>
    %cst_9 = arith.constant 0.000000e+00 : f32
    %9 = vector.broadcast %cst_9 : f32 to vector<8x128xf32>
    %c0_10 = arith.constant 0 : index
    %c0_11 = arith.constant 0 : index
    %c0_12 = arith.constant 0 : index
    %10 = vector.load %arg7[%c0_10, %c0_11, %c0_12] : memref<8x8x512xf32, #tpu.memory_space<vmem>>, vector<1x8x512xf32>
    %11 = vector.shape_cast %10 : vector<1x8x512xf32> to vector<8x512xf32>
    %c0_13 = arith.constant 0 : index
    %c0_14 = arith.constant 0 : index
    %12 = vector.load %arg3[%c0_13, %c0_14] : memref<128x512xf32, #tpu.memory_space<vmem>>, vector<128x512xf32>
    %cst_15 = arith.constant dense<0.000000e+00> : vector<8x512xf32>
    %13 = tpu.matmul %8, %12, %cst_15 {dimension_numbers = #tpu.dot_dimension_numbers<[1], [0], [0], [1], [0, 0, 1, 1], [], []>} : vector<8x128xf32>, vector<128x512xf32>, vector<8x512xf32> -> vector<8x512xf32>
    %14 = arith.addf %11, %13 : vector<8x512xf32>
    %15 = vector.extract_strided_slice %14 {offsets = [0, 0], sizes = [8, 128], strides = [1, 1]} : vector<8x512xf32> to vector<8x128xf32>
    %16 = arith.negf %15 : vector<8x128xf32>
    %17 = math.exp %16 : vector<8x128xf32>
    %cst_16 = arith.constant 1.000000e+00 : f32
    %18 = vector.broadcast %cst_16 : f32 to vector<8x128xf32>
    %19 = arith.addf %18, %17 : vector<8x128xf32>
    %20 = arith.divf %18, %19 : vector<8x128xf32>
    %21 = vector.extract_strided_slice %14 {offsets = [0, 128], sizes = [8, 128], strides = [1, 1]} : vector<8x512xf32> to vector<8x128xf32>
    %22 = arith.negf %21 : vector<8x128xf32>
    %23 = math.exp %22 : vector<8x128xf32>
    %cst_17 = arith.constant 1.000000e+00 : f32
    %24 = vector.broadcast %cst_17 : f32 to vector<8x128xf32>
    %25 = arith.addf %24, %23 : vector<8x128xf32>
    %26 = arith.divf %24, %25 : vector<8x128xf32>
    %27 = vector.extract_strided_slice %14 {offsets = [0, 256], sizes = [8, 128], strides = [1, 1]} : vector<8x512xf32> to vector<8x128xf32>
    %28 = math.tanh %27 : vector<8x128xf32>
    %29 = vector.extract_strided_slice %14 {offsets = [0, 384], sizes = [8, 128], strides = [1, 1]} : vector<8x512xf32> to vector<8x128xf32>
    %30 = arith.negf %29 : vector<8x128xf32>
    %31 = math.exp %30 : vector<8x128xf32>
    %cst_18 = arith.constant 1.000000e+00 : f32
    %32 = vector.broadcast %cst_18 : f32 to vector<8x128xf32>
    %33 = arith.addf %32, %31 : vector<8x128xf32>
    %34 = arith.divf %32, %33 : vector<8x128xf32>
    %35 = arith.mulf %26, %9 : vector<8x128xf32>
    %36 = arith.mulf %20, %28 : vector<8x128xf32>
    %37 = arith.addf %35, %36 : vector<8x128xf32>
    %38 = math.tanh %37 : vector<8x128xf32>
    %39 = arith.mulf %34, %38 : vector<8x128xf32>
    %c0_19 = arith.constant 0 : index
    %c0_20 = arith.constant 0 : index
    %c0_21 = arith.constant 0 : index
    %40 = vector.load %arg8[%c0_19, %c0_20, %c0_21] : memref<8x8x128xf32, #tpu.memory_space<vmem>>, vector<1x8x128xf32>
    %41 = vector.shape_cast %40 : vector<1x8x128xf32> to vector<8x128xf32>
    %42 = vector.shape_cast %39 : vector<8x128xf32> to vector<1x8x128xf32>
    tpu.vector_store %arg8[%c0_19, %c0_20, %c0_21], %42 {strides = array<i32>} : memref<8x8x128xf32, #tpu.memory_space<vmem>>, vector<1x8x128xf32>,
    %c1 = arith.constant 1 : index
    %c0_22 = arith.constant 0 : index
    %c0_23 = arith.constant 0 : index
    %43 = vector.load %arg7[%c1, %c0_22, %c0_23] : memref<8x8x512xf32, #tpu.memory_space<vmem>>, vector<1x8x512xf32>
    %44 = vector.shape_cast %43 : vector<1x8x512xf32> to vector<8x512xf32>
    %c0_24 = arith.constant 0 : index
    %c0_25 = arith.constant 0 : index
    %45 = vector.load %arg3[%c0_24, %c0_25] : memref<128x512xf32, #tpu.memory_space<vmem>>, vector<128x512xf32>
    %cst_26 = arith.constant dense<0.000000e+00> : vector<8x512xf32>
    %46 = tpu.matmul %39, %45, %cst_26 {dimension_numbers = #tpu.dot_dimension_numbers<[1], [0], [0], [1], [0, 0, 1, 1], [], []>} : vector<8x128xf32>, vector<128x512xf32>, vector<8x512xf32> -> vector<8x512xf32>
    %47 = arith.addf %44, %46 : vector<8x512xf32>
    %48 = vector.extract_strided_slice %47 {offsets = [0, 0], sizes = [8, 128], strides = [1, 1]} : vector<8x512xf32> to vector<8x128xf32>
    %49 = arith.negf %48 : vector<8x128xf32>
    %50 = math.exp %49 : vector<8x128xf32>
    %cst_27 = arith.constant 1.000000e+00 : f32
    %51 = vector.broadcast %cst_27 : f32 to vector<8x128xf32>
    %52 = arith.addf %51, %50 : vector<8x128xf32>
    %53 = arith.divf %51, %52 : vector<8x128xf32>
    %54 = vector.extract_strided_slice %47 {offsets = [0, 128], sizes = [8, 128], strides = [1, 1]} : vector<8x512xf32> to vector<8x128xf32>
    %55 = arith.negf %54 : vector<8x128xf32>
    %56 = math.exp %55 : vector<8x128xf32>
    %cst_28 = arith.constant 1.000000e+00 : f32
    %57 = vector.broadcast %cst_28 : f32 to vector<8x128xf32>
    %58 = arith.addf %57, %56 : vector<8x128xf32>
    %59 = arith.divf %57, %58 : vector<8x128xf32>
    %60 = vector.extract_strided_slice %47 {offsets = [0, 256], sizes = [8, 128], strides = [1, 1]} : vector<8x512xf32> to vector<8x128xf32>
    %61 = math.tanh %60 : vector<8x128xf32>
    %62 = vector.extract_strided_slice %47 {offsets = [0, 384], sizes = [8, 128], strides = [1, 1]} : vector<8x512xf32> to vector<8x128xf32>
    %63 = arith.negf %62 : vector<8x128xf32>
    %64 = math.exp %63 : vector<8x128xf32>
    %cst_29 = arith.constant 1.000000e+00 : f32
    %65 = vector.broadcast %cst_29 : f32 to vector<8x128xf32>
    %66 = arith.addf %65, %64 : vector<8x128xf32>
    %67 = arith.divf %65, %66 : vector<8x128xf32>
    %68 = arith.mulf %59, %37 : vector<8x128xf32>
    %69 = arith.mulf %53, %61 : vector<8x128xf32>
    %70 = arith.addf %68, %69 : vector<8x128xf32>
    %71 = math.tanh %70 : vector<8x128xf32>
    %72 = arith.mulf %67, %71 : vector<8x128xf32>
    %c1_30 = arith.constant 1 : index
    %c0_31 = arith.constant 0 : index
    %c0_32 = arith.constant 0 : index
    %73 = vector.load %arg8[%c1_30, %c0_31, %c0_32] : memref<8x8x128xf32, #tpu.memory_space<vmem>>, vector<1x8x128xf32>
    %74 = vector.shape_cast %73 : vector<1x8x128xf32> to vector<8x128xf32>
    %75 = vector.shape_cast %72 : vector<8x128xf32> to vector<1x8x128xf32>
    tpu.vector_store %arg8[%c1_30, %c0_31, %c0_32], %75 {strides = array<i32>} : memref<8x8x128xf32, #tpu.memory_space<vmem>>, vector<1x8x128xf32>,
    %c2 = arith.constant 2 : index
    %c0_33 = arith.constant 0 : index
    %c0_34 = arith.constant 0 : index
    %76 = vector.load %arg7[%c2, %c0_33, %c0_34] : memref<8x8x512xf32, #tpu.memory_space<vmem>>, vector<1x8x512xf32>
    %77 = vector.shape_cast %76 : vector<1x8x512xf32> to vector<8x512xf32>
    %c0_35 = arith.constant 0 : index
    %c0_36 = arith.constant 0 : index
    %78 = vector.load %arg3[%c0_35, %c0_36] : memref<128x512xf32, #tpu.memory_space<vmem>>, vector<128x512xf32>
    %cst_37 = arith.constant dense<0.000000e+00> : vector<8x512xf32>
    %79 = tpu.matmul %72, %78, %cst_37 {dimension_numbers = #tpu.dot_dimension_numbers<[1], [0], [0], [1], [0, 0, 1, 1], [], []>} : vector<8x128xf32>, vector<128x512xf32>, vector<8x512xf32> -> vector<8x512xf32>
    %80 = arith.addf %77, %79 : vector<8x512xf32>
    %81 = vector.extract_strided_slice %80 {offsets = [0, 0], sizes = [8, 128], strides = [1, 1]} : vector<8x512xf32> to vector<8x128xf32>
    %82 = arith.negf %81 : vector<8x128xf32>
    %83 = math.exp %82 : vector<8x128xf32>
    %cst_38 = arith.constant 1.000000e+00 : f32
    %84 = vector.broadcast %cst_38 : f32 to vector<8x128xf32>
    %85 = arith.addf %84, %83 : vector<8x128xf32>
    %86 = arith.divf %84, %85 : vector<8x128xf32>
    %87 = vector.extract_strided_slice %80 {offsets = [0, 128], sizes = [8, 128], strides = [1, 1]} : vector<8x512xf32> to vector<8x128xf32>
    %88 = arith.negf %87 : vector<8x128xf32>
    %89 = math.exp %88 : vector<8x128xf32>
    %cst_39 = arith.constant 1.000000e+00 : f32
    %90 = vector.broadcast %cst_39 : f32 to vector<8x128xf32>
    %91 = arith.addf %90, %89 : vector<8x128xf32>
    %92 = arith.divf %90, %91 : vector<8x128xf32>
    %93 = vector.extract_strided_slice %80 {offsets = [0, 256], sizes = [8, 128], strides = [1, 1]} : vector<8x512xf32> to vector<8x128xf32>
    %94 = math.tanh %93 : vector<8x128xf32>
    %95 = vector.extract_strided_slice %80 {offsets = [0, 384], sizes = [8, 128], strides = [1, 1]} : vector<8x512xf32> to vector<8x128xf32>
    %96 = arith.negf %95 : vector<8x128xf32>
    %97 = math.exp %96 : vector<8x128xf32>
    %cst_40 = arith.constant 1.000000e+00 : f32
    %98 = vector.broadcast %cst_40 : f32 to vector<8x128xf32>
    %99 = arith.addf %98, %97 : vector<8x128xf32>
    %100 = arith.divf %98, %99 : vector<8x128xf32>
    %101 = arith.mulf %92, %70 : vector<8x128xf32>
    %102 = arith.mulf %86, %94 : vector<8x128xf32>
    %103 = arith.addf %101, %102 : vector<8x128xf32>
    %104 = math.tanh %103 : vector<8x128xf32>
    %105 = arith.mulf %100, %104 : vector<8x128xf32>
    %c2_41 = arith.constant 2 : index
    %c0_42 = arith.constant 0 : index
    %c0_43 = arith.constant 0 : index
    %106 = vector.load %arg8[%c2_41, %c0_42, %c0_43] : memref<8x8x128xf32, #tpu.memory_space<vmem>>, vector<1x8x128xf32>
    %107 = vector.shape_cast %106 : vector<1x8x128xf32> to vector<8x128xf32>
    %108 = vector.shape_cast %105 : vector<8x128xf32> to vector<1x8x128xf32>
    tpu.vector_store %arg8[%c2_41, %c0_42, %c0_43], %108 {strides = array<i32>} : memref<8x8x128xf32, #tpu.memory_space<vmem>>, vector<1x8x128xf32>,
    %c3 = arith.constant 3 : index
    %c0_44 = arith.constant 0 : index
    %c0_45 = arith.constant 0 : index
    %109 = vector.load %arg7[%c3, %c0_44, %c0_45] : memref<8x8x512xf32, #tpu.memory_space<vmem>>, vector<1x8x512xf32>
    %110 = vector.shape_cast %109 : vector<1x8x512xf32> to vector<8x512xf32>
    %c0_46 = arith.constant 0 : index
    %c0_47 = arith.constant 0 : index
    %111 = vector.load %arg3[%c0_46, %c0_47] : memref<128x512xf32, #tpu.memory_space<vmem>>, vector<128x512xf32>
    %cst_48 = arith.constant dense<0.000000e+00> : vector<8x512xf32>
    %112 = tpu.matmul %105, %111, %cst_48 {dimension_numbers = #tpu.dot_dimension_numbers<[1], [0], [0], [1], [0, 0, 1, 1], [], []>} : vector<8x128xf32>, vector<128x512xf32>, vector<8x512xf32> -> vector<8x512xf32>
    %113 = arith.addf %110, %112 : vector<8x512xf32>
    %114 = vector.extract_strided_slice %113 {offsets = [0, 0], sizes = [8, 128], strides = [1, 1]} : vector<8x512xf32> to vector<8x128xf32>
    %115 = arith.negf %114 : vector<8x128xf32>
    %116 = math.exp %115 : vector<8x128xf32>
    %cst_49 = arith.constant 1.000000e+00 : f32
    %117 = vector.broadcast %cst_49 : f32 to vector<8x128xf32>
    %118 = arith.addf %117, %116 : vector<8x128xf32>
    %119 = arith.divf %117, %118 : vector<8x128xf32>
    %120 = vector.extract_strided_slice %113 {offsets = [0, 128], sizes = [8, 128], strides = [1, 1]} : vector<8x512xf32> to vector<8x128xf32>
    %121 = arith.negf %120 : vector<8x128xf32>
    %122 = math.exp %121 : vector<8x128xf32>
    %cst_50 = arith.constant 1.000000e+00 : f32
    %123 = vector.broadcast %cst_50 : f32 to vector<8x128xf32>
    %124 = arith.addf %123, %122 : vector<8x128xf32>
    %125 = arith.divf %123, %124 : vector<8x128xf32>
    %126 = vector.extract_strided_slice %113 {offsets = [0, 256], sizes = [8, 128], strides = [1, 1]} : vector<8x512xf32> to vector<8x128xf32>
    %127 = math.tanh %126 : vector<8x128xf32>
    %128 = vector.extract_strided_slice %113 {offsets = [0, 384], sizes = [8, 128], strides = [1, 1]} : vector<8x512xf32> to vector<8x128xf32>
    %129 = arith.negf %128 : vector<8x128xf32>
    %130 = math.exp %129 : vector<8x128xf32>
    %cst_51 = arith.constant 1.000000e+00 : f32
    %131 = vector.broadcast %cst_51 : f32 to vector<8x128xf32>
    %132 = arith.addf %131, %130 : vector<8x128xf32>
    %133 = arith.divf %131, %132 : vector<8x128xf32>
    %134 = arith.mulf %125, %103 : vector<8x128xf32>
    %135 = arith.mulf %119, %127 : vector<8x128xf32>
    %136 = arith.addf %134, %135 : vector<8x128xf32>
    %137 = math.tanh %136 : vector<8x128xf32>
    %138 = arith.mulf %133, %137 : vector<8x128xf32>
    %c3_52 = arith.constant 3 : index
    %c0_53 = arith.constant 0 : index
    %c0_54 = arith.constant 0 : index
    %139 = vector.load %arg8[%c3_52, %c0_53, %c0_54] : memref<8x8x128xf32, #tpu.memory_space<vmem>>, vector<1x8x128xf32>
    %140 = vector.shape_cast %139 : vector<1x8x128xf32> to vector<8x128xf32>
    %141 = vector.shape_cast %138 : vector<8x128xf32> to vector<1x8x128xf32>
    tpu.vector_store %arg8[%c3_52, %c0_53, %c0_54], %141 {strides = array<i32>} : memref<8x8x128xf32, #tpu.memory_space<vmem>>, vector<1x8x128xf32>,
    %c4 = arith.constant 4 : index
    %c0_55 = arith.constant 0 : index
    %c0_56 = arith.constant 0 : index
    %142 = vector.load %arg7[%c4, %c0_55, %c0_56] : memref<8x8x512xf32, #tpu.memory_space<vmem>>, vector<1x8x512xf32>
    %143 = vector.shape_cast %142 : vector<1x8x512xf32> to vector<8x512xf32>
    %c0_57 = arith.constant 0 : index
    %c0_58 = arith.constant 0 : index
    %144 = vector.load %arg3[%c0_57, %c0_58] : memref<128x512xf32, #tpu.memory_space<vmem>>, vector<128x512xf32>
    %cst_59 = arith.constant dense<0.000000e+00> : vector<8x512xf32>
    %145 = tpu.matmul %138, %144, %cst_59 {dimension_numbers = #tpu.dot_dimension_numbers<[1], [0], [0], [1], [0, 0, 1, 1], [], []>} : vector<8x128xf32>, vector<128x512xf32>, vector<8x512xf32> -> vector<8x512xf32>
    %146 = arith.addf %143, %145 : vector<8x512xf32>
    %147 = vector.extract_strided_slice %146 {offsets = [0, 0], sizes = [8, 128], strides = [1, 1]} : vector<8x512xf32> to vector<8x128xf32>
    %148 = arith.negf %147 : vector<8x128xf32>
    %149 = math.exp %148 : vector<8x128xf32>
    %cst_60 = arith.constant 1.000000e+00 : f32
    %150 = vector.broadcast %cst_60 : f32 to vector<8x128xf32>
    %151 = arith.addf %150, %149 : vector<8x128xf32>
    %152 = arith.divf %150, %151 : vector<8x128xf32>
    %153 = vector.extract_strided_slice %146 {offsets = [0, 128], sizes = [8, 128], strides = [1, 1]} : vector<8x512xf32> to vector<8x128xf32>
    %154 = arith.negf %153 : vector<8x128xf32>
    %155 = math.exp %154 : vector<8x128xf32>
    %cst_61 = arith.constant 1.000000e+00 : f32
    %156 = vector.broadcast %cst_61 : f32 to vector<8x128xf32>
    %157 = arith.addf %156, %155 : vector<8x128xf32>
    %158 = arith.divf %156, %157 : vector<8x128xf32>
    %159 = vector.extract_strided_slice %146 {offsets = [0, 256], sizes = [8, 128], strides = [1, 1]} : vector<8x512xf32> to vector<8x128xf32>
    %160 = math.tanh %159 : vector<8x128xf32>
    %161 = vector.extract_strided_slice %146 {offsets = [0, 384], sizes = [8, 128], strides = [1, 1]} : vector<8x512xf32> to vector<8x128xf32>
    %162 = arith.negf %161 : vector<8x128xf32>
    %163 = math.exp %162 : vector<8x128xf32>
    %cst_62 = arith.constant 1.000000e+00 : f32
    %164 = vector.broadcast %cst_62 : f32 to vector<8x128xf32>
    %165 = arith.addf %164, %163 : vector<8x128xf32>
    %166 = arith.divf %164, %165 : vector<8x128xf32>
    %167 = arith.mulf %158, %136 : vector<8x128xf32>
    %168 = arith.mulf %152, %160 : vector<8x128xf32>
    %169 = arith.addf %167, %168 : vector<8x128xf32>
    %170 = math.tanh %169 : vector<8x128xf32>
    %171 = arith.mulf %166, %170 : vector<8x128xf32>
    %c4_63 = arith.constant 4 : index
    %c0_64 = arith.constant 0 : index
    %c0_65 = arith.constant 0 : index
    %172 = vector.load %arg8[%c4_63, %c0_64, %c0_65] : memref<8x8x128xf32, #tpu.memory_space<vmem>>, vector<1x8x128xf32>
    %173 = vector.shape_cast %172 : vector<1x8x128xf32> to vector<8x128xf32>
    %174 = vector.shape_cast %171 : vector<8x128xf32> to vector<1x8x128xf32>
    tpu.vector_store %arg8[%c4_63, %c0_64, %c0_65], %174 {strides = array<i32>} : memref<8x8x128xf32, #tpu.memory_space<vmem>>, vector<1x8x128xf32>,
    %c5 = arith.constant 5 : index
    %c0_66 = arith.constant 0 : index
    %c0_67 = arith.constant 0 : index
    %175 = vector.load %arg7[%c5, %c0_66, %c0_67] : memref<8x8x512xf32, #tpu.memory_space<vmem>>, vector<1x8x512xf32>
    %176 = vector.shape_cast %175 : vector<1x8x512xf32> to vector<8x512xf32>
    %c0_68 = arith.constant 0 : index
    %c0_69 = arith.constant 0 : index
    %177 = vector.load %arg3[%c0_68, %c0_69] : memref<128x512xf32, #tpu.memory_space<vmem>>, vector<128x512xf32>
    %cst_70 = arith.constant dense<0.000000e+00> : vector<8x512xf32>
    %178 = tpu.matmul %171, %177, %cst_70 {dimension_numbers = #tpu.dot_dimension_numbers<[1], [0], [0], [1], [0, 0, 1, 1], [], []>} : vector<8x128xf32>, vector<128x512xf32>, vector<8x512xf32> -> vector<8x512xf32>
    %179 = arith.addf %176, %178 : vector<8x512xf32>
    %180 = vector.extract_strided_slice %179 {offsets = [0, 0], sizes = [8, 128], strides = [1, 1]} : vector<8x512xf32> to vector<8x128xf32>
    %181 = arith.negf %180 : vector<8x128xf32>
    %182 = math.exp %181 : vector<8x128xf32>
    %cst_71 = arith.constant 1.000000e+00 : f32
    %183 = vector.broadcast %cst_71 : f32 to vector<8x128xf32>
    %184 = arith.addf %183, %182 : vector<8x128xf32>
    %185 = arith.divf %183, %184 : vector<8x128xf32>
    %186 = vector.extract_strided_slice %179 {offsets = [0, 128], sizes = [8, 128], strides = [1, 1]} : vector<8x512xf32> to vector<8x128xf32>
    %187 = arith.negf %186 : vector<8x128xf32>
    %188 = math.exp %187 : vector<8x128xf32>
    %cst_72 = arith.constant 1.000000e+00 : f32
    %189 = vector.broadcast %cst_72 : f32 to vector<8x128xf32>
    %190 = arith.addf %189, %188 : vector<8x128xf32>
    %191 = arith.divf %189, %190 : vector<8x128xf32>
    %192 = vector.extract_strided_slice %179 {offsets = [0, 256], sizes = [8, 128], strides = [1, 1]} : vector<8x512xf32> to vector<8x128xf32>
    %193 = math.tanh %192 : vector<8x128xf32>
    %194 = vector.extract_strided_slice %179 {offsets = [0, 384], sizes = [8, 128], strides = [1, 1]} : vector<8x512xf32> to vector<8x128xf32>
    %195 = arith.negf %194 : vector<8x128xf32>
    %196 = math.exp %195 : vector<8x128xf32>
    %cst_73 = arith.constant 1.000000e+00 : f32
    %197 = vector.broadcast %cst_73 : f32 to vector<8x128xf32>
    %198 = arith.addf %197, %196 : vector<8x128xf32>
    %199 = arith.divf %197, %198 : vector<8x128xf32>
    %200 = arith.mulf %191, %169 : vector<8x128xf32>
    %201 = arith.mulf %185, %193 : vector<8x128xf32>
    %202 = arith.addf %200, %201 : vector<8x128xf32>
    %203 = math.tanh %202 : vector<8x128xf32>
    %204 = arith.mulf %199, %203 : vector<8x128xf32>
    %c5_74 = arith.constant 5 : index
    %c0_75 = arith.constant 0 : index
    %c0_76 = arith.constant 0 : index
    %205 = vector.load %arg8[%c5_74, %c0_75, %c0_76] : memref<8x8x128xf32, #tpu.memory_space<vmem>>, vector<1x8x128xf32>
    %206 = vector.shape_cast %205 : vector<1x8x128xf32> to vector<8x128xf32>
    %207 = vector.shape_cast %204 : vector<8x128xf32> to vector<1x8x128xf32>
    tpu.vector_store %arg8[%c5_74, %c0_75, %c0_76], %207 {strides = array<i32>} : memref<8x8x128xf32, #tpu.memory_space<vmem>>, vector<1x8x128xf32>,
    %c6 = arith.constant 6 : index
    %c0_77 = arith.constant 0 : index
    %c0_78 = arith.constant 0 : index
    %208 = vector.load %arg7[%c6, %c0_77, %c0_78] : memref<8x8x512xf32, #tpu.memory_space<vmem>>, vector<1x8x512xf32>
    %209 = vector.shape_cast %208 : vector<1x8x512xf32> to vector<8x512xf32>
    %c0_79 = arith.constant 0 : index
    %c0_80 = arith.constant 0 : index
    %210 = vector.load %arg3[%c0_79, %c0_80] : memref<128x512xf32, #tpu.memory_space<vmem>>, vector<128x512xf32>
    %cst_81 = arith.constant dense<0.000000e+00> : vector<8x512xf32>
    %211 = tpu.matmul %204, %210, %cst_81 {dimension_numbers = #tpu.dot_dimension_numbers<[1], [0], [0], [1], [0, 0, 1, 1], [], []>} : vector<8x128xf32>, vector<128x512xf32>, vector<8x512xf32> -> vector<8x512xf32>
    %212 = arith.addf %209, %211 : vector<8x512xf32>
    %213 = vector.extract_strided_slice %212 {offsets = [0, 0], sizes = [8, 128], strides = [1, 1]} : vector<8x512xf32> to vector<8x128xf32>
    %214 = arith.negf %213 : vector<8x128xf32>
    %215 = math.exp %214 : vector<8x128xf32>
    %cst_82 = arith.constant 1.000000e+00 : f32
    %216 = vector.broadcast %cst_82 : f32 to vector<8x128xf32>
    %217 = arith.addf %216, %215 : vector<8x128xf32>
    %218 = arith.divf %216, %217 : vector<8x128xf32>
    %219 = vector.extract_strided_slice %212 {offsets = [0, 128], sizes = [8, 128], strides = [1, 1]} : vector<8x512xf32> to vector<8x128xf32>
    %220 = arith.negf %219 : vector<8x128xf32>
    %221 = math.exp %220 : vector<8x128xf32>
    %cst_83 = arith.constant 1.000000e+00 : f32
    %222 = vector.broadcast %cst_83 : f32 to vector<8x128xf32>
    %223 = arith.addf %222, %221 : vector<8x128xf32>
    %224 = arith.divf %222, %223 : vector<8x128xf32>
    %225 = vector.extract_strided_slice %212 {offsets = [0, 256], sizes = [8, 128], strides = [1, 1]} : vector<8x512xf32> to vector<8x128xf32>
    %226 = math.tanh %225 : vector<8x128xf32>
    %227 = vector.extract_strided_slice %212 {offsets = [0, 384], sizes = [8, 128], strides = [1, 1]} : vector<8x512xf32> to vector<8x128xf32>
    %228 = arith.negf %227 : vector<8x128xf32>
    %229 = math.exp %228 : vector<8x128xf32>
    %cst_84 = arith.constant 1.000000e+00 : f32
    %230 = vector.broadcast %cst_84 : f32 to vector<8x128xf32>
    %231 = arith.addf %230, %229 : vector<8x128xf32>
    %232 = arith.divf %230, %231 : vector<8x128xf32>
    %233 = arith.mulf %224, %202 : vector<8x128xf32>
    %234 = arith.mulf %218, %226 : vector<8x128xf32>
    %235 = arith.addf %233, %234 : vector<8x128xf32>
    %236 = math.tanh %235 : vector<8x128xf32>
    %237 = arith.mulf %232, %236 : vector<8x128xf32>
    %c6_85 = arith.constant 6 : index
    %c0_86 = arith.constant 0 : index
    %c0_87 = arith.constant 0 : index
    %238 = vector.load %arg8[%c6_85, %c0_86, %c0_87] : memref<8x8x128xf32, #tpu.memory_space<vmem>>, vector<1x8x128xf32>
    %239 = vector.shape_cast %238 : vector<1x8x128xf32> to vector<8x128xf32>
    %240 = vector.shape_cast %237 : vector<8x128xf32> to vector<1x8x128xf32>
    tpu.vector_store %arg8[%c6_85, %c0_86, %c0_87], %240 {strides = array<i32>} : memref<8x8x128xf32, #tpu.memory_space<vmem>>, vector<1x8x128xf32>,
    %c7 = arith.constant 7 : index
    %c0_88 = arith.constant 0 : index
    %c0_89 = arith.constant 0 : index
    %241 = vector.load %arg7[%c7, %c0_88, %c0_89] : memref<8x8x512xf32, #tpu.memory_space<vmem>>, vector<1x8x512xf32>
    %242 = vector.shape_cast %241 : vector<1x8x512xf32> to vector<8x512xf32>
    %c0_90 = arith.constant 0 : index
    %c0_91 = arith.constant 0 : index
    %243 = vector.load %arg3[%c0_90, %c0_91] : memref<128x512xf32, #tpu.memory_space<vmem>>, vector<128x512xf32>
    %cst_92 = arith.constant dense<0.000000e+00> : vector<8x512xf32>
    %244 = tpu.matmul %237, %243, %cst_92 {dimension_numbers = #tpu.dot_dimension_numbers<[1], [0], [0], [1], [0, 0, 1, 1], [], []>} : vector<8x128xf32>, vector<128x512xf32>, vector<8x512xf32> -> vector<8x512xf32>
    %245 = arith.addf %242, %244 : vector<8x512xf32>
    %246 = vector.extract_strided_slice %245 {offsets = [0, 0], sizes = [8, 128], strides = [1, 1]} : vector<8x512xf32> to vector<8x128xf32>
    %247 = arith.negf %246 : vector<8x128xf32>
    %248 = math.exp %247 : vector<8x128xf32>
    %cst_93 = arith.constant 1.000000e+00 : f32
    %249 = vector.broadcast %cst_93 : f32 to vector<8x128xf32>
    %250 = arith.addf %249, %248 : vector<8x128xf32>
    %251 = arith.divf %249, %250 : vector<8x128xf32>
    %252 = vector.extract_strided_slice %245 {offsets = [0, 128], sizes = [8, 128], strides = [1, 1]} : vector<8x512xf32> to vector<8x128xf32>
    %253 = arith.negf %252 : vector<8x128xf32>
    %254 = math.exp %253 : vector<8x128xf32>
    %cst_94 = arith.constant 1.000000e+00 : f32
    %255 = vector.broadcast %cst_94 : f32 to vector<8x128xf32>
    %256 = arith.addf %255, %254 : vector<8x128xf32>
    %257 = arith.divf %255, %256 : vector<8x128xf32>
    %258 = vector.extract_strided_slice %245 {offsets = [0, 256], sizes = [8, 128], strides = [1, 1]} : vector<8x512xf32> to vector<8x128xf32>
    %259 = math.tanh %258 : vector<8x128xf32>
    %260 = vector.extract_strided_slice %245 {offsets = [0, 384], sizes = [8, 128], strides = [1, 1]} : vector<8x512xf32> to vector<8x128xf32>
    %261 = arith.negf %260 : vector<8x128xf32>
    %262 = math.exp %261 : vector<8x128xf32>
    %cst_95 = arith.constant 1.000000e+00 : f32
    %263 = vector.broadcast %cst_95 : f32 to vector<8x128xf32>
    %264 = arith.addf %263, %262 : vector<8x128xf32>
    %265 = arith.divf %263, %264 : vector<8x128xf32>
    %266 = arith.mulf %257, %235 : vector<8x128xf32>
    %267 = arith.mulf %251, %259 : vector<8x128xf32>
    %268 = arith.addf %266, %267 : vector<8x128xf32>
    %269 = math.tanh %268 : vector<8x128xf32>
    %270 = arith.mulf %265, %269 : vector<8x128xf32>
    %c7_96 = arith.constant 7 : index
    %c0_97 = arith.constant 0 : index
    %c0_98 = arith.constant 0 : index
    %271 = vector.load %arg8[%c7_96, %c0_97, %c0_98] : memref<8x8x128xf32, #tpu.memory_space<vmem>>, vector<1x8x128xf32>
    %272 = vector.shape_cast %271 : vector<1x8x128xf32> to vector<8x128xf32>
    %273 = vector.shape_cast %270 : vector<8x128xf32> to vector<1x8x128xf32>
    tpu.vector_store %arg8[%c7_96, %c0_97, %c0_98], %273 {strides = array<i32>} : memref<8x8x128xf32, #tpu.memory_space<vmem>>, vector<1x8x128xf32>,
    %c0_99 = arith.constant 0 : index
    %c0_100 = arith.constant 0 : index
    %c0_101 = arith.constant 0 : index
    %274 = vector.load %arg8[%c0_99, %c0_100, %c0_101] : memref<8x8x128xf32, #tpu.memory_space<vmem>>, vector<8x8x128xf32>
    %275 = vector.shape_cast %274 : vector<8x8x128xf32> to vector<64x128xf32>
    %c0_102 = arith.constant 0 : index
    %c0_103 = arith.constant 0 : index
    %276 = vector.load %arg5[%c0_102, %c0_103] : memref<128x128xf32, #tpu.memory_space<vmem>>, vector<128x128xf32>
    %cst_104 = arith.constant dense<0.000000e+00> : vector<64x128xf32>
    %277 = tpu.matmul %275, %276, %cst_104 {dimension_numbers = #tpu.dot_dimension_numbers<[1], [0], [0], [1], [0, 0, 1, 1], [], []>} : vector<64x128xf32>, vector<128x128xf32>, vector<64x128xf32> -> vector<64x128xf32>
    %c0_105 = arith.constant 0 : index
    %c0_106 = arith.constant 0 : index
    %278 = vector.load %arg6[%c0_105, %c0_106] : memref<64x128xf32, #tpu.memory_space<vmem>>, vector<64x128xf32>
    tpu.vector_store %arg6[%c0_105, %c0_106], %277 {strides = array<i32>} : memref<64x128xf32, #tpu.memory_space<vmem>>, vector<64x128xf32>,
    return
  }
  func.func @transform_0(%arg0: i32) -> (i32, i32) {
    %c0_i32 = arith.constant 0 : i32
    %c0_i32_0 = arith.constant 0 : i32
    %c0_i32_1 = arith.constant 0 : i32
    return %c0_i32, %c0_i32_0 : i32, i32
  }
  func.func @transform_1(%arg0: i32) -> (i32, i32) {
    %c0_i32 = arith.constant 0 : i32
    %c0_i32_0 = arith.constant 0 : i32
    %c0_i32_1 = arith.constant 0 : i32
    return %c0_i32, %c0_i32_0 : i32, i32
  }
  func.func @transform_2(%arg0: i32) -> (i32, i32) {
    %c0_i32 = arith.constant 0 : i32
    %c0_i32_0 = arith.constant 0 : i32
    %c0_i32_1 = arith.constant 0 : i32
    return %c0_i32, %c0_i32_0 : i32, i32
  }
  func.func @transform_3(%arg0: i32) -> (i32, i32) {
    %c0_i32 = arith.constant 0 : i32
    %c0_i32_0 = arith.constant 0 : i32
    %c0_i32_1 = arith.constant 0 : i32
    return %c0_i32, %c0_i32_0 : i32, i32
  }
  func.func @transform_4(%arg0: i32) -> (i32, i32) {
    %c0_i32 = arith.constant 0 : i32
    %c0_i32_0 = arith.constant 0 : i32
    %c0_i32_1 = arith.constant 0 : i32
    return %c0_i32, %c0_i32_0 : i32, i32
  }
  func.func @transform_5(%arg0: i32) -> (i32, i32) {
    %c0_i32 = arith.constant 0 : i32
    %c0_i32_0 = arith.constant 0 : i32
    %c0_i32_1 = arith.constant 0 : i32
    return %c0_i32, %c0_i32_0 : i32, i32
  }
}

</mosaic_0001>

<bundles_post_ra>
// kernel: simple_lstm_net.1
= control target key start
LH: loop header
LB: loop body
LE: loop exit
PB: predicated region body
PF: predicated region fallthrough
CT: control target
= control target key end

     0   :  { %10 = vsyncpa [#allocation5], 0  ;;  %s3847_s0 = inlined_call_operand.vmem [shape: f32[64,32], index: 0, kind: input, shape index: {}]   ;;  %s3848_s1 = inlined_call_operand.hbm [shape: f32[32,512], index: 1, kind: input, shape index: {}]   ;;  %s3849_s2 = inlined_call_operand.hbm [shape: f32[128,512], index: 2, kind: input, shape index: {}]   ;;  %s3850_s3 = inlined_call_operand.vmem [shape: f32[1,512], index: 3, kind: input, shape index: {}]   ;;  %s3851_s4 = inlined_call_operand.hbm [shape: f32[128,128], index: 4, kind: input, shape index: {}]   ;;  %s3852_s5 = inlined_call_operand.vmem [shape: f32[64,128], index: 5, kind: output, shape index: {}]  }
   0x1   :  { %11 = vsyncpa [#allocation7], 0  ;;  %s2767_s18 = smov [#allocation6]   ;;  %s2768_s20 = smov [#allocation4]  }
   0x2   :  { %s31_s19 = sshll.u32 %s2767_s18, 4  ;;  %s19_s21 = sshll.u32 %s2768_s20, 4  ;;  %s32_s19 = int_to_ptr.vmem [resolvable:$true] %s31_s19  ;;  %s20_s21 = int_to_ptr.vmem [resolvable:$true] %s19_s21 }
   0x3   :  { %s2711_s22 = scalar_lea.vmem %s32_s19, 8192  ;;  %p2716_p1 = scmp.lt.s32.totalorder %s32_s19, %s32_s19 }
   0x4   :  { %p2712_p0 = scmp.ne.s32.totalorder %s32_s19, %s2711_s22  ;;  %p2717_p2 = scmp.lt.s32.totalorder %s2711_s22, %s2711_s22 }
   0x6   :  { %p2718_p3 = por %p2717_p2, %p2716_p1 }
   0x8   :  { %p2719_p4 = pnand %p2718_p3, %p2712_p0 }
   0xa   :  { %2722 = shalt.err (!%p2719_p4)
}
   0xb   :  { %s2769_s23 = smov 512   ;;  %s2770_s24 = smov 32  }
   0xc   :  { %37 = dma.hbm_to_vmem [thread:$0]  %s3849_s2, 8192, %s32_s19, [#allocation7], %s2769_s23, %s2769_s23, %s2770_s24  }
   0xd   :  { %s2731_s27 = scalar_lea.vmem %s20_s21, 2048  ;;  %p2736_p6 = scmp.lt.s32.totalorder %s20_s21, %s20_s21 }
   0xe   :  { %p2732_p5 = scmp.ne.s32.totalorder %s20_s21, %s2731_s27  ;;  %p2737_p7 = scmp.lt.s32.totalorder %s2731_s27, %s2731_s27 }
  0x10   :  { %p2738_p8 = por %p2737_p7, %p2736_p6 }
  0x12   :  { %p2739_p9 = pnand %p2738_p8, %p2732_p5 }
  0x14   :  { %2742 = shalt.err (!%p2739_p9)
}
  0x15   :  { %25 = dma.hbm_to_vmem [thread:$0]  %s3848_s1, 2048, %s20_s21, [#allocation5], %s2769_s23, %s2769_s23, %s2770_s24  }
  0x16   :  { %s2771_s30 = smov [#allocation8]  }
  0x17   :  { %s45_s6 = sshll.u32 %s2771_s30, 4  ;;  %s46_s6 = int_to_ptr.vmem [resolvable:$true] %s45_s6 }
  0x18   :  { %s2751_s7 = scalar_lea.vmem %s46_s6, 2048  ;;  %p2756_p11 = scmp.lt.s32.totalorder %s46_s6, %s46_s6 }
  0x19   :  { %p2752_p10 = scmp.ne.s32.totalorder %s46_s6, %s2751_s7  ;;  %p2757_p12 = scmp.lt.s32.totalorder %s2751_s7, %s2751_s7 }
  0x1b   :  { %p2758_p13 = por %p2757_p12, %p2756_p11 }
  0x1d   :  { %p2759_p0 = pnand %p2758_p13, %p2752_p10 }
  0x1f   :  { %2762 = shalt.err (!%p2759_p0)
}
  0x20   :  { %s2772_s2 = smov 128   ;;  %s2773_s8 = smov 8  }
  0x21   :  { %51 = dma.hbm_to_vmem [thread:$0]  %s3851_s4, 2048, %s46_s6, [#allocation7], %s2772_s2, %s2772_s2, %s2773_s8  }
  0x22   :  { %2763 = dma.done.wait [#allocation5], 2048  }
  0x23   :  { %2764 = vsyncadd [#allocation5], 4294965248 }
  0x24   :  { %2765 = dma.done.wait [#allocation7], 10240  }
  0x25   :  { %2766 = vsyncadd [#allocation7], 4294957056  ;;  %v3855_v0 = vmov 0.0   ;;  %v84_v1 = vld [vmem:[#allocation4 + $0x78] sm:$0xff]  ;;  %v83_v2 = vld [vmem:[#allocation4 + $0x70] sm:$0xff]  ;;  %vm107_vm0 = vcmask 261120  }
  0x26   :  { %309 = vmatprep.mubr.f32.mxu1 %v3855_v0  ;;  %196 = vmatprep.mubr.f32.mxu0 %v3855_v0  ;;  %v80_v3 = vld [vmem:[#allocation4 + $0x58] sm:$0xff]  ;;  %v79_v4 = vld [vmem:[#allocation4 + $0x50] sm:$0xff]  ;;  %v2819_v9 = vld [vmem:[%s3847_s0] sm:$0xff] }
  0x27   :  { %269 = vmatprep.subr.mxu1 %v84_v1  ;;  %v76_v5 = vld [vmem:[#allocation4 + $0x38] sm:$0xff]  ;;  %v75_v6 = vld [vmem:[#allocation4 + $0x30] sm:$0xff]  ;;  %v2821_v10 = vld [vmem:[#allocation6 + $0x1e8] sm:$0xff] }
  0x28   :  { %270 = vmatpush1.msra.mxu1 %v83_v2  ;;  %v72_v7 = vld [vmem:[#allocation4 + $0x18] sm:$0xff]  ;;  %v71_v8 = vld [vmem:[#allocation4 + $0x10] sm:$0xff]  ;;  %v2823_v11 = vld [vmem:[#allocation6 + $0x1e0] sm:$0xff] }
  0x29   :  { %271 = vmatprep.subr.mxu1 %v80_v3  ;;  %v2825_v12 = vld [vmem:[#allocation6 + $0x1c8] sm:$0xff]  ;;  %v2830_v13 = vld [vmem:[#allocation6 + $0x1c0] sm:$0xff]  ;;  %v2857_v21 = vld [vmem:[%s3847_s0 + $0x10] sm:$0xff] }
  0x2a   :  { %272 = vmatpush1.msra.mxu1 %v79_v4  ;;  %v2837_v14 = vld [vmem:[%s3847_s0 + $0x8] sm:$0xff]  ;;  %v2842_v16 = vld [vmem:[#allocation6 + $0x1a0] sm:$0xff]  ;;  %v2877_v28 = vld [vmem:[%s3847_s0 + $0x18] sm:$0xff] }
  0x2b   :  { %273 = vmatprep.subr.mxu1 %v76_v5  ;;  %v2839_v15 = vld [vmem:[#allocation6 + $0x1a8] sm:$0xff]  ;;  %v2850_v19 = vld [vmem:[#allocation6 + $0x180] sm:$0xff]  ;;  %v2937_v47 = vld [vmem:[%s3847_s0 + $0x30] sm:$0xff] }
  0x2c   :  { %274 = vmatpush1.msra.mxu1 %v75_v6  ;;  %v2845_v17 = vld [vmem:[#allocation6 + $0x188] sm:$0xff]  ;;  %v81_v20 = vld [vmem:[#allocation4 + $0x60] sm:$0xff]  ;;  %v2960_v52 = vld [vmem:[%s3847_s0 + $0x38] sm:$0xff] }
  0x2d   :  { %275 = vmatprep.subr.mxu1 %v72_v7  ;;  %v82_v18 = vld [vmem:[#allocation4 + $0x68] sm:$0xff]  ;;  %v2862_v23 = vld [vmem:[#allocation6 + $0x160] sm:$0xff]  ;;  %v2979_v57 = vld [vmem:[#allocation6 + $0x1f8] sm:$0xff] }
  0x2e   :  { %276 = vmatpush1.msra.mxu1 %v71_v8  ;;  %v2859_v22 = vld [vmem:[#allocation6 + $0x168] sm:$0xff]  ;;  %156 = vmatprep.subr.mxu0 %v82_v18  ;;  %v2870_v26 = vld [vmem:[#allocation6 + $0x140] sm:$0xff]  ;;  %3938 = vst [vmem:[#allocation22_spill] sm:$0xff] %v2979_v57  ;;  %v2982_v58 = vld [vmem:[#allocation6 + $0x1f0] sm:$0xff] }
  0x2f   :  { %2467 = vmatmul.mubr.msk.f32.vlgmr.msra.gmra.mxu1 %vm107_vm0, %v2819_v9  ;;  %458 = vmatprep.subr.mxu1 %v2821_v10  ;;  %v2865_v24 = vld [vmem:[#allocation6 + $0x148] sm:$0xff]  ;;  %v77_v27 = vld [vmem:[#allocation4 + $0x40] sm:$0xff]  ;;  %v2986_v59 = vld [vmem:[#allocation6 + $0x1d8] sm:$0xff] }
  0x30   :  { %459 = vmatpush1.msra.mxu1 %v2823_v11  ;;  %315 = vmatprep.mubr.f32.mxu1 %v3855_v0  ;;  %v78_v25 = vld [vmem:[#allocation4 + $0x48] sm:$0xff]  ;;  %v2882_v30 = vld [vmem:[#allocation6 + $0x120] sm:$0xff]  ;;  %v2992_v60 = vld [vmem:[#allocation6 + $0x1d0] sm:$0xff] }
  0x31   :  { %460 = vmatprep.subr.mxu1 %v2825_v12  ;;  %157 = vmatpush1.msra.mxu0 %v81_v20  ;;  %v2879_v29 = vld [vmem:[#allocation6 + $0x128] sm:$0xff]  ;;  %v2890_v33 = vld [vmem:[#allocation6 + $0x100] sm:$0xff]  ;;  %v2995_v61 = vld [vmem:[#allocation6 + $0x1b8] sm:$0xff] }
  0x32   :  { %461 = vmatpush1.msra.mxu1 %v2830_v13  ;;  %158 = vmatprep.subr.mxu0 %v78_v25  ;;  %v2885_v31 = vld [vmem:[#allocation6 + $0x108] sm:$0xff]  ;;  %v73_v34 = vld [vmem:[#allocation4 + $0x20] sm:$0xff]  ;;  %v2999_v62 = vld [vmem:[#allocation6 + $0x1b0] sm:$0xff] }
  0x33   :  { %2468 = vmatmul.mubr.msk.f32.gmra.mxu1 %vm107_vm0, %v2837_v14  ;;  %462 = vmatprep.subr.mxu1 %v2839_v15  ;;  %v74_v32 = vld [vmem:[#allocation4 + $0x28] sm:$0xff]  ;;  %v2897_v35 = vld [vmem:[%s3847_s0 + $0x20] sm:$0xff]  ;;  %v3003_v63 = vld [vmem:[#allocation6 + $0x198] sm:$0xff] }
  0x34   :  { %463 = vmatpush1.msra.mxu1 %v2842_v16  ;;  %321 = vmatprep.mubr.f32.mxu1 %v3855_v0  ;;  %v2899_v36 = vld [vmem:[#allocation6 + $0xe8] sm:$0xff]  ;;  %v2902_v37 = vld [vmem:[#allocation6 + $0xe0] sm:$0xff]  ;;  %v3007_v1 = vld [vmem:[#allocation6 + $0x190] sm:$0xff] }
  0x35   :  { %464 = vmatprep.subr.mxu1 %v2845_v17  ;;  %159 = vmatpush1.msra.mxu0 %v77_v27  ;;  %3927 = vst [vmem:[#allocation11_spill] sm:$0xff] %v2899_v36  ;;  %3928 = vst [vmem:[#allocation12_spill] sm:$0xff] %v2902_v37  ;;  %v2905_v38 = vld [vmem:[#allocation6 + $0xc8] sm:$0xff]  ;;  %v2910_v40 = vld [vmem:[#allocation6 + $0xc0] sm:$0xff] }
  0x36   :  { %465 = vmatpush1.msra.mxu1 %v2850_v19  ;;  %160 = vmatprep.subr.mxu0 %v74_v32  ;;  %3929 = vst [vmem:[#allocation13_spill] sm:$0xff] %v2905_v38  ;;  %v70_v39 = vld [vmem:[#allocation4 + $0x8] sm:$0xff]  ;;  %v69_v41 = vld [vmem:[#allocation4] sm:$0xff]  ;;  %v3011_v2 = vld [vmem:[#allocation6 + $0x178] sm:$0xff] }
  0x37   :  { %2469 = vmatmul.mubr.msk.f32.gmra.mxu1 %vm107_vm0, %v2857_v21  ;;  %466 = vmatprep.subr.mxu1 %v2859_v22  ;;  %v2917_v42 = vld [vmem:[%s3847_s0 + $0x28] sm:$0xff]  ;;  %v2922_v44 = vld [vmem:[#allocation6 + $0xa0] sm:$0xff]  ;;  %v3015_v3 = vld [vmem:[#allocation6 + $0x170] sm:$0xff] }
  0x38   :  { %467 = vmatpush1.msra.mxu1 %v2862_v23  ;;  %327 = vmatprep.mubr.f32.mxu1 %v3855_v0  ;;  %v2919_v43 = vld [vmem:[#allocation6 + $0xa8] sm:$0xff]  ;;  %v2930_v46 = vld [vmem:[#allocation6 + $0x80] sm:$0xff]  ;;  %v3019_v4 = vld [vmem:[#allocation6 + $0x158] sm:$0xff] }
  0x39   :  { %468 = vmatprep.subr.mxu1 %v2865_v24  ;;  %161 = vmatpush1.msra.mxu0 %v73_v34  ;;  %v2925_v45 = vld [vmem:[#allocation6 + $0x88] sm:$0xff]  ;;  %v2942_v49 = vld [vmem:[#allocation6 + $0x60] sm:$0xff]  ;;  %v3024_v5 = vld [vmem:[#allocation6 + $0x150] sm:$0xff] }
  0x3a   :  { %469 = vmatpush1.msra.mxu1 %v2870_v26  ;;  %162 = vmatprep.subr.mxu0 %v70_v39  ;;  %v2939_v48 = vld [vmem:[#allocation6 + $0x68] sm:$0xff]  ;;  %3931 = vst [vmem:[#allocation15_spill] sm:$0xff] %v2942_v49  ;;  %v2953_v51 = vld [vmem:[#allocation6 + $0x40] sm:$0xff]  ;;  %v3028_v6 = vld [vmem:[#allocation6 + $0x138] sm:$0xff] }
  0x3b   :  { %2470 = vmatmul.mubr.msk.f32.gmra.mxu1 %vm107_vm0, %v2877_v28  ;;  %470 = vmatprep.subr.mxu1 %v2879_v29  ;;  %3930 = vst [vmem:[#allocation14_spill] sm:$0xff] %v2939_v48  ;;  %v2947_v50 = vld [vmem:[#allocation6 + $0x48] sm:$0xff]  ;;  %3933 = vst [vmem:[#allocation17_spill] sm:$0xff] %v2953_v51  ;;  %v2965_v54 = vld [vmem:[#allocation6 + $0x20] sm:$0xff] }
  0x3c   :  { %471 = vmatpush1.msra.mxu1 %v2882_v30  ;;  %333 = vmatprep.mubr.f32.mxu1 %v3855_v0  ;;  %3932 = vst [vmem:[#allocation16_spill] sm:$0xff] %v2947_v50  ;;  %v2962_v53 = vld [vmem:[#allocation6 + $0x28] sm:$0xff]  ;;  %3935 = vst [vmem:[#allocation19_spill] sm:$0xff] %v2965_v54  ;;  %v2975_v56 = vld [vmem:[#allocation6] sm:$0xff] }
  0x3d   :  { %472 = vmatprep.subr.mxu1 %v2885_v31  ;;  %163 = vmatpush1.msra.mxu0 %v69_v41  ;;  %3934 = vst [vmem:[#allocation18_spill] sm:$0xff] %v2962_v53  ;;  %v2969_v55 = vld [vmem:[#allocation6 + $0x8] sm:$0xff]  ;;  %3937 = vst [vmem:[#allocation21_spill] sm:$0xff] %v2975_v56  ;;  %v3032_v7 = vld [vmem:[#allocation6 + $0x130] sm:$0xff] }
  0x3e   :  { %473 = vmatpush1.msra.mxu1 %v2890_v33  ;;  %2459 = vmatmul.mubr.msk.f32.vlgmr.msra.gmra.mxu0 %vm107_vm0, %v2819_v9  ;;  %3936 = vst [vmem:[#allocation20_spill] sm:$0xff] %v2969_v55  ;;  %v3036_v8 = vld [vmem:[#allocation6 + $0x118] sm:$0xff]  ;;  %v3040_v9 = vld [vmem:[#allocation6 + $0x110] sm:$0xff] }
  0x3f   :  { %2471 = vmatmul.mubr.msk.f32.gmra.mxu1 %vm107_vm0, %v2897_v35  ;;  %474 = vmatprep.subr.mxu1 %v2899_v36  ;;  %v3049_v18 = vld [vmem:[#allocation6 + $0xf0] sm:$0xff]  ;;  %v3053_v20 = vld [vmem:[#allocation6 + $0xd8] sm:$0xff] }
  0x40   :  { %475 = vmatpush1.msra.mxu1 %v2902_v37  ;;  %339 = vmatprep.mubr.f32.mxu1 %v3855_v0  ;;  %v3061_v25 = vld [vmem:[#allocation6 + $0xb8] sm:$0xff]  ;;  %v3065_v27 = vld [vmem:[#allocation6 + $0xb0] sm:$0xff] }
  0x41   :  { %476 = vmatprep.subr.mxu1 %v2905_v38  ;;  %698 = vmatprep.subr.mxu0 %v2821_v10  ;;  %v3074_v32 = vld [vmem:[#allocation6 + $0x90] sm:$0xff]  ;;  %v3078_v34 = vld [vmem:[#allocation6 + $0x78] sm:$0xff] }
  0x42   :  { %477 = vmatpush1.msra.mxu1 %v2910_v40  ;;  %699 = vmatpush1.msra.mxu0 %v2823_v11  ;;  %3939 = vst [vmem:[#allocation23_spill] sm:$0xff] %v3074_v32  ;;  %3940 = vst [vmem:[#allocation24_spill] sm:$0xff] %v3078_v34  ;;  %v3082_v39 = vld [vmem:[#allocation6 + $0x70] sm:$0xff] }
  0x43   :  { %2472 = vmatmul.mubr.msk.f32.gmra.mxu1 %vm107_vm0, %v2917_v42  ;;  %478 = vmatprep.subr.mxu1 %v2919_v43  ;;  %3941 = vst [vmem:[#allocation25_spill] sm:$0xff] %v3082_v39  ;;  %v3090_v41 = vld [vmem:[#allocation6 + $0x50] sm:$0xff] }
  0x44   :  { %479 = vmatpush1.msra.mxu1 %v2922_v44  ;;  %345 = vmatprep.mubr.f32.mxu1 %v3855_v0  ;;  %3943 = vst [vmem:[#allocation27_spill] sm:$0xff] %v3090_v41 }
  0x45   :  { %480 = vmatprep.subr.mxu1 %v2925_v45  ;;  %202 = vmatprep.mubr.f32.mxu0 %v3855_v0 }
  0x46   :  { %481 = vmatpush1.msra.mxu1 %v2930_v46  ;;  %700 = vmatprep.subr.mxu0 %v2825_v12 }
  0x47   :  { %2473 = vmatmul.mubr.msk.f32.gmra.mxu1 %vm107_vm0, %v2937_v47  ;;  %482 = vmatprep.subr.mxu1 %v2939_v48 }
  0x48   :  { %483 = vmatpush1.msra.mxu1 %v2942_v49  ;;  %351 = vmatprep.mubr.f32.mxu1 %v3855_v0 }
  0x49   :  { %484 = vmatprep.subr.mxu1 %v2947_v50  ;;  %2460 = vmatmul.mubr.msk.f32.gmra.mxu0 %vm107_vm0, %v2837_v14  ;;  %v3044_v14 = vld [vmem:[#allocation6 + $0xf8] sm:$0xff] }
  0x4a   :  { %485 = vmatpush1.msra.mxu1 %v2953_v51  ;;  %701 = vmatpush1.msra.mxu0 %v2830_v13 }
  0x4b   :  { %2474 = vmatmul.mubr.msk.f32.gmra.mxu1 %vm107_vm0, %v2960_v52  ;;  %486 = vmatprep.subr.mxu1 %v2962_v53 }
  0x4c   :  { %487 = vmatpush1.msra.mxu1 %v2965_v54  ;;  %522 = vmatprep.mubr.f32.mxu1 %v3855_v0 }
  0x4d   :  { %488 = vmatprep.subr.mxu1 %v2969_v55  ;;  %702 = vmatprep.subr.mxu0 %v2839_v15 }
  0x4e   :  { %489 = vmatpush1.msra.mxu1 %v2975_v56  ;;  %703 = vmatpush1.msra.mxu0 %v2842_v16 }
  0x4f   :  { %523 = vmatmul.mubr.f32.vlgmr.msra.gmra.mxu1 %v3855_v0  ;;  %529 = vmatprep.subr.mxu1 %v2979_v57 }
  0x50   :  { %530 = vmatpush1.msra.mxu1 %v2982_v58  ;;  %593 = vmatprep.mubr.f32.mxu1 %v3855_v0 }
  0x51   :  { %531 = vmatprep.subr.mxu1 %v2986_v59  ;;  %208 = vmatprep.mubr.f32.mxu0 %v3855_v0 }
  0x52   :  { %532 = vmatpush1.msra.mxu1 %v2992_v60  ;;  %704 = vmatprep.subr.mxu0 %v2845_v17 }
  0x53   :  { %533 = vmatprep.subr.mxu1 %v2995_v61  ;;  %2461 = vmatmul.mubr.msk.f32.gmra.mxu0 %vm107_vm0, %v2857_v21  ;;  %v3057_v21 = vld [vmem:[#allocation6 + $0xd0] sm:$0xff] }
  0x54   :  { %534 = vmatpush1.msra.mxu1 %v2999_v62  ;;  %705 = vmatpush1.msra.mxu0 %v2850_v19 }
  0x55   :  { %535 = vmatprep.subr.mxu1 %v3003_v63  ;;  %706 = vmatprep.subr.mxu0 %v2859_v22 }
  0x56   :  { %536 = vmatpush1.msra.mxu1 %v3007_v1  ;;  %707 = vmatpush1.msra.mxu0 %v2862_v23 }
  0x57   :  { %537 = vmatprep.subr.mxu1 %v3011_v2  ;;  %214 = vmatprep.mubr.f32.mxu0 %v3855_v0 }
  0x58   :  { %538 = vmatpush1.msra.mxu1 %v3015_v3  ;;  %708 = vmatprep.subr.mxu0 %v2865_v24 }
  0x59   :  { %539 = vmatprep.subr.mxu1 %v3019_v4  ;;  %2462 = vmatmul.mubr.msk.f32.gmra.mxu0 %vm107_vm0, %v2877_v28  ;;  %v3069_v28 = vld [vmem:[#allocation6 + $0x98] sm:$0xff] }
  0x5a   :  { %540 = vmatpush1.msra.mxu1 %v3024_v5  ;;  %709 = vmatpush1.msra.mxu0 %v2870_v26 }
  0x5b   :  { %541 = vmatprep.subr.mxu1 %v3028_v6  ;;  %710 = vmatprep.subr.mxu0 %v2879_v29 }
  0x5c   :  { %542 = vmatpush1.msra.mxu1 %v3032_v7  ;;  %711 = vmatpush1.msra.mxu0 %v2882_v30 }
  0x5d   :  { %543 = vmatprep.subr.mxu1 %v3036_v8  ;;  %220 = vmatprep.mubr.f32.mxu0 %v3855_v0 }
  0x5e   :  { %544 = vmatpush1.msra.mxu1 %v3040_v9  ;;  %712 = vmatprep.subr.mxu0 %v2885_v31 }
  0x5f   :  { %545 = vmatprep.subr.mxu1 %v3044_v14  ;;  %2463 = vmatmul.mubr.msk.f32.gmra.mxu0 %vm107_vm0, %v2897_v35  ;;  %v3086_v35 = vld [vmem:[#allocation6 + $0x58] sm:$0xff] }
  0x60   :  { %546 = vmatpush1.msra.mxu1 %v3049_v18  ;;  %713 = vmatpush1.msra.mxu0 %v2890_v33  ;;  %3942 = vst [vmem:[#allocation26_spill] sm:$0xff] %v3086_v35 }
  0x61   :  { %547 = vmatprep.subr.mxu1 %v3053_v20  ;;  %714 = vmatprep.subr.mxu0 %v2899_v36  ;;  %v3094_v36 = vld [vmem:[#allocation6 + $0x38] sm:$0xff] }
  0x62   :  { %548 = vmatpush1.msra.mxu1 %v3057_v21  ;;  %715 = vmatpush1.msra.mxu0 %v2902_v37  ;;  %3944 = vst [vmem:[#allocation28_spill] sm:$0xff] %v3094_v36  ;;  %v3099_v37 = vld [vmem:[#allocation6 + $0x30] sm:$0xff] }
  0x63   :  { %549 = vmatprep.subr.mxu1 %v3061_v25  ;;  %226 = vmatprep.mubr.f32.mxu0 %v3855_v0  ;;  %3945 = vst [vmem:[#allocation29_spill] sm:$0xff] %v3099_v37  ;;  %v3103_v0 = vld [vmem:[#allocation6 + $0x18] sm:$0xff] }
  0x64   :  { %550 = vmatpush1.msra.mxu1 %v3065_v27  ;;  %716 = vmatprep.subr.mxu0 %v2905_v38  ;;  %3946 = vst [vmem:[#allocation30_spill] sm:$0xff] %v3103_v0  ;;  %v3107_v38 = vld [vmem:[#allocation6 + $0x10] sm:$0xff] }
  0x65   :  { %551 = vmatprep.subr.mxu1 %v3069_v28  ;;  %2464 = vmatmul.mubr.msk.f32.gmra.mxu0 %vm107_vm0, %v2917_v42  ;;  %3947 = vst [vmem:[#allocation31_spill] sm:$0xff] %v3107_v38  ;;  %v3948_v42 = vmov 0.0  }
  0x66   :  { %552 = vmatpush1.msra.mxu1 %v3074_v32  ;;  %717 = vmatpush1.msra.mxu0 %v2910_v40 }
  0x67   :  { %553 = vmatprep.subr.mxu1 %v3078_v34  ;;  %718 = vmatprep.subr.mxu0 %v2919_v43 }
  0x68   :  { %554 = vmatpush1.msra.mxu1 %v3082_v39  ;;  %719 = vmatpush1.msra.mxu0 %v2922_v44 }
  0x69   :  { %555 = vmatprep.subr.mxu1 %v3086_v35  ;;  %232 = vmatprep.mubr.f32.mxu0 %v3948_v42 }
  0x6a   :  { %556 = vmatpush1.msra.mxu1 %v3090_v41  ;;  %720 = vmatprep.subr.mxu0 %v2925_v45 }
  0x6b   :  { %557 = vmatprep.subr.mxu1 %v3094_v36  ;;  %2465 = vmatmul.mubr.msk.f32.gmra.mxu0 %vm107_vm0, %v2937_v47 }
  0x6c   :  { %558 = vmatpush1.msra.mxu1 %v3099_v37  ;;  %721 = vmatpush1.msra.mxu0 %v2930_v46 }
  0x6d   :  { %559 = vmatprep.subr.mxu1 %v3103_v0  ;;  %722 = vmatprep.subr.mxu0 %v2939_v48 }
  0x6e   :  { %560 = vmatpush1.msra.mxu1 %v3107_v38  ;;  %723 = vmatpush1.msra.mxu0 %v2942_v49 }
  0x6f   :  { %594 = vmatmul.mubr.f32.vlgmr.msra.gmra.mxu1 %v3948_v42  ;;  %769 = vmatprep.subr.mxu1 %v2979_v57 }
  0x70   :  { %770 = vmatpush1.msra.mxu1 %v2982_v58  ;;  %238 = vmatprep.mubr.f32.mxu0 %v3948_v42 }
  0x71   :  { %771 = vmatprep.subr.mxu1 %v2986_v59  ;;  %724 = vmatprep.subr.mxu0 %v2947_v50 }
  0x72   :  { %772 = vmatpush1.msra.mxu1 %v2992_v60  ;;  %2466 = vmatmul.mubr.msk.f32.gmra.mxu0 %vm107_vm0, %v2960_v52 }
  0x73   :  { %773 = vmatprep.subr.mxu1 %v2995_v61  ;;  %725 = vmatpush1.msra.mxu0 %v2953_v51 }
  0x74   :  { %774 = vmatpush1.msra.mxu1 %v2999_v62  ;;  %726 = vmatprep.subr.mxu0 %v2962_v53 }
  0x75   :  { %775 = vmatprep.subr.mxu1 %v3003_v63  ;;  %727 = vmatpush1.msra.mxu0 %v2965_v54 }
  0x76   :  { %776 = vmatpush1.msra.mxu1 %v3007_v1  ;;  %728 = vmatprep.subr.mxu0 %v2969_v55 }
  0x77   :  { %777 = vmatprep.subr.mxu1 %v3011_v2  ;;  %729 = vmatpush1.msra.mxu0 %v2975_v56 }
  0x78   :  { %778 = vmatpush1.msra.mxu1 %v3015_v3  ;;  %762 = vmatprep.mubr.f32.mxu0 %v3948_v42 }
  0x79   :  { %779 = vmatprep.subr.mxu1 %v3019_v4  ;;  %833 = vmatprep.mubr.f32.mxu1 %v3948_v42  ;;  %v85_v42 = vld [vmem:[%s3850_s3] sm:$0xf] }
  0x7a   :  { %780 = vmatpush1.msra.mxu1 %v3024_v5  ;;  %939 = vmatprep.subr.mxu0 %v2821_v10  ;;  %v87_v10 = vlaneseq }
  0x7b   :  { %781 = vmatprep.subr.mxu1 %v3028_v6 }
  0x7c   :  { %782 = vmatpush1.msra.mxu1 %v3032_v7  ;;  %v88_v47 = vshrl.u32 %v87_v10, 7 }
  0x7d   :  { %783 = vmatprep.subr.mxu1 %v3036_v8 }
  0x7e   :  { %784 = vmatpush1.msra.mxu1 %v3040_v9  ;;  %v97_v52 = vsub.s32 2, %v88_v47  ;;  %v101_v55 = vsub.s32 3, %v88_v47 }
  0x7f   :  { %785 = vmatprep.subr.mxu1 %v3044_v14 }
  0x80   :  { %786 = vmatpush1.msra.mxu1 %v3049_v18 }
  0x81   :  { %787 = vmatprep.subr.mxu1 %v3053_v20 }
  0x82   :  { %788 = vmatpush1.msra.mxu1 %v3057_v21 }
  0x83   :  { %789 = vmatprep.subr.mxu1 %v3061_v25 }
  0x84   :  { %790 = vmatpush1.msra.mxu1 %v3065_v27 }
  0x85   :  { %791 = vmatprep.subr.mxu1 %v3069_v28 }
  0x86   :  { %792 = vmatpush1.msra.mxu1 %v3074_v32 }
  0x87   :  { %793 = vmatprep.subr.mxu1 %v3078_v34 }
  0x88   :  { %794 = vmatpush1.msra.mxu1 %v3082_v39  ;;  %v93_v39 = vsub.s32 1, %v88_v47 }
  0x89   :  { %795 = vmatprep.subr.mxu1 %v3086_v35 }
  0x8a   :  { %796 = vmatpush1.msra.mxu1 %v3090_v41 }
  0x8b   :  { %797 = vmatprep.subr.mxu1 %v3094_v36  ;;  %v3173_v36 = vrot.slane %v85_v42, %v97_v52 }
  0x8c   :  { %798 = vmatpush1.msra.mxu1 %v3099_v37 }
  0x8d   :  { %799 = vmatprep.subr.mxu1 %v3103_v0  ;;  %v3175_v0 = vrot.slane %v85_v42, %v101_v55 }
  0x8e   :  { %800 = vmatpush1.msra.mxu1 %v3107_v38 }
  0x8f   :  { %1010 = vmatprep.subr.mxu1 %v2979_v57 }
  0xef   :  { %v3169_v56 = vpop.f32.mrf.mxu1 }
  0xf1   :  { %v3171_v54 = vpop.f32.mrf.mxu1 }
  0xf3   :  { %v317_v37 = vpop.f32.mrf.mxu1 }
  0xf4   :  { %v3178_v38 = vadd.f32 %v317_v37, %v3173_v36 }
  0xf5   :  { %v319_v57 = vpop.f32.mrf.mxu1 }
  0xf6   :  { %3949 = vst [vmem:[#allocation32_spill] sm:$0xff] %v3178_v38  ;;  %v3181_v10 = vadd.f32 %v319_v57, %v3175_v0 }
  0xf7   :  { %v323_v53 = vpop.f32.mrf.mxu1 }
  0xf8   :  { %3950 = vst [vmem:[#allocation33_spill] sm:$0xff] %v3181_v10  ;;  %v3184_v41 = vadd.f32 %v323_v53, %v3173_v36 }
  0xf9   :  { %v325_v51 = vpop.f32.mrf.mxu1 }
  0xfa   :  { %3951 = vst [vmem:[#allocation34_spill] sm:$0xff] %v3184_v41  ;;  %v3187_v35 = vadd.f32 %v325_v51, %v3175_v0 }
  0xfb   :  { %v329_v52 = vpop.f32.mrf.mxu1 }
  0xfc   :  { %3952 = vst [vmem:[#allocation35_spill] sm:$0xff] %v3187_v35  ;;  %v3190_v50 = vadd.f32 %v329_v52, %v3173_v36 }
  0xfd   :  { %v331_v55 = vpop.f32.mrf.mxu1 }
  0xfe   :  { %3953 = vst [vmem:[#allocation36_spill] sm:$0xff] %v3190_v50  ;;  %v3193_v37 = vadd.f32 %v331_v55, %v3175_v0 }
  0xff   :  { %v335_v38 = vpop.f32.mrf.mxu1 }
 0x100   :  { %3954 = vst [vmem:[#allocation37_spill] sm:$0xff] %v3193_v37  ;;  %v3196_v57 = vadd.f32 %v335_v38, %v3173_v36  ;;  %v198_v37 = vpop.f32.mrf.mxu0 }
 0x101   :  { %v337_v10 = vpop.f32.mrf.mxu1 }
 0x102   :  { %3955 = vst [vmem:[#allocation38_spill] sm:$0xff] %v3196_v57  ;;  %v3199_v53 = vadd.f32 %v337_v10, %v3175_v0  ;;  %v89_v57 = vsub.s32 0, %v88_v47 }
 0x103   :  { %v341_v41 = vpop.f32.mrf.mxu1 }
 0x104   :  { %3956 = vst [vmem:[#allocation39_spill] sm:$0xff] %v3199_v53  ;;  %v3202_v51 = vadd.f32 %v341_v41, %v3173_v36  ;;  %v3216_v41 = vrot.slane %v85_v42, %v93_v39 }
 0x105   :  { %v343_v35 = vpop.f32.mrf.mxu1 }
 0x106   :  { %3957 = vst [vmem:[#allocation40_spill] sm:$0xff] %v3202_v51  ;;  %v3205_v52 = vadd.f32 %v343_v35, %v3175_v0  ;;  %3962 = vst [vmem:[#allocation45_spill] sm:$0xff] %v3216_v41  ;;  %v200_v51 = vpop.f32.mrf.mxu0  ;;  %v3218_v35 = vrot.slane %v85_v42, %v89_v57 }
 0x107   :  { %v347_v50 = vpop.f32.mrf.mxu1  ;;  %v201_v47 = vadd.f32 %v200_v51, %v3216_v41 }
 0x108   :  { %3958 = vst [vmem:[#allocation41_spill] sm:$0xff] %v3205_v52  ;;  %v3208_v55 = vadd.f32 %v347_v50, %v3173_v36 }
 0x109   :  { %v349_v38 = vpop.f32.mrf.mxu1 }
 0x10a   :  { %3959 = vst [vmem:[#allocation42_spill] sm:$0xff] %v3208_v55  ;;  %v3211_v49 = vadd.f32 %v349_v38, %v3175_v0  ;;  %v3223_v55 = vpop.f32.mrf.mxu0  ;;  %v199_v38 = vadd.f32 %v198_v37, %v3218_v35 }
 0x10b   :  { %v353_v10 = vpop.f32.mrf.mxu1  ;;  %3964 = vst [vmem:[#allocation47_spill] sm:$0xff] %v3223_v55 }
 0x10c   :  { %3960 = vst [vmem:[#allocation43_spill] sm:$0xff] %v3211_v49  ;;  %v3214_v53 = vadd.f32 %v353_v10, %v3173_v36  ;;  %v3227_v48 = vpop.f32.mrf.mxu0 }
 0x10d   :  { %v355_v52 = vpop.f32.mrf.mxu1 }
 0x10e   :  { %3961 = vst [vmem:[#allocation44_spill] sm:$0xff] %v3214_v53  ;;  %v3221_v50 = vadd.f32 %v355_v52, %v3175_v0 }
 0x10f   :  { %v524_v34 = vpop.f32.mrf.mxu1 }
 0x110   :  { %3963 = vst [vmem:[#allocation46_spill] sm:$0xff] %v3221_v50  ;;  %v600_v39 = vadd.f32 %v524_v34, %v199_v38 }
 0x111   :  { %v526_v49 = vpop.f32.mrf.mxu1 }
 0x112   :  { %v601_v10 = vadd.f32 %v526_v49, %v201_v47  ;;  %v2475_v52 = vmul.f32 -1.442695, %v600_v39 }
 0x113   :  { %v210_v53 = vpop.f32.mrf.mxu0 }
 0x114   :  { %v3230_v42 = vadd.f32 %v210_v53, %v3218_v35  ;;  %v2476_v57 = vmul.f32 -1.442695, %v601_v10 }
 0x115   :  { %v212_v32 = vpop.f32.mrf.mxu0 }
 0x116   :  { %v3233_v50 = vadd.f32 %v212_v32, %v3216_v41  ;;  %2575 = vpow2.f32 %v2476_v57 }
 0x117   :  { %2577 = vpow2.f32 %v2475_v52 }
 0x118   :  { %3965 = vst [vmem:[#allocation48_spill] sm:$0xff] %v3233_v50 }
 0x119   :  { %v216_v55 = vpop.f32.mrf.mxu0 }
 0x11a   :  { %v3236_v37 = vadd.f32 %v216_v55, %v3218_v35 }
 0x11b   :  { %v218_v51 = vpop.f32.mrf.mxu0 }
 0x11c   :  { %3966 = vst [vmem:[#allocation49_spill] sm:$0xff] %v3236_v37  ;;  %v3239_v49 = vadd.f32 %v218_v51, %v3216_v41 }
 0x11e   :  { %3967 = vst [vmem:[#allocation50_spill] sm:$0xff] %v3239_v49 }
 0x11f   :  { %v222_v34 = vpop.f32.mrf.mxu0 }
 0x120   :  { %v3242_v53 = vadd.f32 %v222_v34, %v3218_v35  ;;  %v312_v34 = vadd.f32 %v3169_v56, %v3173_v36 }
 0x121   :  { %v224_v47 = vpop.f32.mrf.mxu0 }
 0x122   :  { %3968 = vst [vmem:[#allocation51_spill] sm:$0xff] %v3242_v53  ;;  %v3245_v38 = vadd.f32 %v224_v47, %v3216_v41 }
 0x123   :  { %v2576_v10 = vpop.eup %2575 }
 0x124   :  { %3969 = vst [vmem:[#allocation52_spill] sm:$0xff] %v3245_v38  ;;  %v2578_v57 = vpop.eup %2577  ;;  %v613_v51 = vadd.f32 1.0, %v2576_v10  ;;  %v314_v38 = vadd.f32 %v3171_v54, %v3175_v0 }
 0x125   :  { %v228_v32 = vpop.f32.mrf.mxu0  ;;  %v607_v49 = vadd.f32 1.0, %v2578_v57 }
 0x126   :  { %v3248_v39 = vadd.f32 %v228_v32, %v3218_v35  ;;  %2579 = vrcp.f32 %v613_v51 }
 0x127   :  { %v230_v55 = vpop.f32.mrf.mxu0  ;;  %2581 = vrcp.f32 %v607_v49 }
 0x128   :  { %3970 = vst [vmem:[#allocation53_spill] sm:$0xff] %v3248_v39  ;;  %v3251_v52 = vadd.f32 %v230_v55, %v3216_v41 }
 0x12a   :  { %3971 = vst [vmem:[#allocation54_spill] sm:$0xff] %v3251_v52 }
 0x12b   :  { %v234_v53 = vpop.f32.mrf.mxu0 }
 0x12c   :  { %v3256_v47 = vadd.f32 %v234_v53, %v3218_v35 }
 0x12d   :  { %v236_v39 = vpop.f32.mrf.mxu0 }
 0x12e   :  { %3972 = vst [vmem:[#allocation55_spill] sm:$0xff] %v3256_v47  ;;  %v3261_v55 = vadd.f32 %v236_v39, %v3216_v41 }
 0x12f   :  { %v595_v37 = vpop.f32.mrf.mxu1 }
 0x130   :  { %v602_v32 = vadd.f32 %v595_v37, %v312_v34  ;;  %3973 = vst [vmem:[#allocation56_spill] sm:$0xff] %v3261_v55  ;;  %v4001_v34 = vld [vmem:[#allocation32_spill] sm:$0xff] }
 0x131   :  { %v597_v50 = vpop.f32.mrf.mxu1  ;;  %v4024_v55 = vld [vmem:[#allocation48_spill] sm:$0xff] }
 0x132   :  { %2583 = vtanh.f32 %v602_v32  ;;  %v603_v10 = vadd.f32 %v597_v50, %v314_v38  ;;  %v240_v36 = vpop.f32.mrf.mxu0 }
 0x133   :  { %v3264_v56 = vadd.f32 %v240_v36, %v3218_v35  ;;  %v2580_v53 = vpop.eup %2579 }
 0x134   :  { %v2477_v57 = vmul.f32 -1.442695, %v603_v10  ;;  %v2582_v47 = vpop.eup %2581  ;;  %v623_v0 = vmul.f32 0.0, %v2580_v53 }
 0x135   :  { %3974 = vst [vmem:[#allocation57_spill] sm:$0xff] %v3264_v56  ;;  %v3523_v56 = vld [vmem:[#allocation6 + $0x10] sm:$0xff] }
 0x136   :  { %2585 = vpow2.f32 %v2477_v57 }
 0x13f   :  { %v2584_v52 = vpop.eup %2583 }
 0x140   :  { %v624_v54 = vmul.f32 %v2584_v52, %v2582_v47 }
 0x142   :  { %v3266_v37 = vadd.f32 %v624_v54, %v623_v0 }
 0x143   :  { %v2586_v49 = vpop.eup %2585 }
 0x144   :  { %v620_v51 = vadd.f32 1.0, %v2586_v49  ;;  %2587 = vtanh.f32 %v3266_v37 }
 0x146   :  { %2589 = vrcp.f32 %v620_v51 }
 0x151   :  { %v2588_v39 = vpop.eup %2587 }
 0x153   :  { %v2590_v50 = vpop.eup %2589 }
 0x154   :  { %v3269_v38 = vmul.f32 %v2590_v50, %v2588_v39 }
 0x156   :  { %3975 = vst [vmem:[#allocation58_spill] sm:$0xff] %v3269_v38  ;;  %763 = vmatmul.mubr.f32.vlgmr.msra.gmra.mxu0 %v3269_v38  ;;  %834 = vmatmul.mubr.f32.vlgmr.msra.gmra.mxu1 %v3269_v38 }
 0x157   :  { %940 = vmatpush1.msra.mxu0 %v2823_v11  ;;  %1011 = vmatpush1.msra.mxu1 %v2982_v58  ;;  %v3976_v11 = vld [vmem:[#allocation11_spill] sm:$0xff] }
 0x158   :  { %941 = vmatprep.subr.mxu0 %v2825_v12  ;;  %1012 = vmatprep.subr.mxu1 %v2986_v59  ;;  %v3977_v12 = vld [vmem:[#allocation12_spill] sm:$0xff] }
 0x159   :  { %942 = vmatpush1.msra.mxu0 %v2830_v13  ;;  %1013 = vmatpush1.msra.mxu1 %v2992_v60  ;;  %v3978_v13 = vld [vmem:[#allocation13_spill] sm:$0xff] }
 0x15a   :  { %943 = vmatprep.subr.mxu0 %v2839_v15  ;;  %1014 = vmatprep.subr.mxu1 %v2995_v61  ;;  %v3979_v15 = vld [vmem:[#allocation23_spill] sm:$0xff] }
 0x15b   :  { %944 = vmatpush1.msra.mxu0 %v2842_v16  ;;  %1015 = vmatpush1.msra.mxu1 %v2999_v62  ;;  %v3980_v16 = vld [vmem:[#allocation14_spill] sm:$0xff] }
 0x15c   :  { %945 = vmatprep.subr.mxu0 %v2845_v17  ;;  %1016 = vmatprep.subr.mxu1 %v3003_v63  ;;  %v3981_v17 = vld [vmem:[#allocation24_spill] sm:$0xff] }
 0x15d   :  { %946 = vmatpush1.msra.mxu0 %v2850_v19  ;;  %1017 = vmatpush1.msra.mxu1 %v3007_v1  ;;  %v3982_v19 = vld [vmem:[#allocation15_spill] sm:$0xff] }
 0x15e   :  { %947 = vmatprep.subr.mxu0 %v2859_v22  ;;  %1018 = vmatprep.subr.mxu1 %v3011_v2  ;;  %v3983_v22 = vld [vmem:[#allocation25_spill] sm:$0xff]  ;;  %v3996_v2 = vld [vmem:[#allocation31_spill] sm:$0xff] }
 0x15f   :  { %948 = vmatpush1.msra.mxu0 %v2862_v23  ;;  %1019 = vmatpush1.msra.mxu1 %v3015_v3  ;;  %v3984_v23 = vld [vmem:[#allocation16_spill] sm:$0xff]  ;;  %v3997_v3 = vld [vmem:[#allocation22_spill] sm:$0xff] }
 0x160   :  { %949 = vmatprep.subr.mxu0 %v2865_v24  ;;  %1020 = vmatprep.subr.mxu1 %v3019_v4  ;;  %v3985_v24 = vld [vmem:[#allocation26_spill] sm:$0xff]  ;;  %v3338_v4 = vpop.f32.mrf.mxu0 }
 0x161   :  { %950 = vmatpush1.msra.mxu0 %v2870_v26  ;;  %1021 = vmatpush1.msra.mxu1 %v3024_v5  ;;  %v3986_v26 = vld [vmem:[#allocation17_spill] sm:$0xff]  ;;  %3998 = vst [vmem:[#allocation11_spill] sm:$0xff] %v3338_v4  ;;  %v3999_v5 = vld [vmem:[#allocation47_spill] sm:$0xff] }
 0x162   :  { %951 = vmatprep.subr.mxu0 %v2879_v29  ;;  %1022 = vmatprep.subr.mxu1 %v3028_v6  ;;  %v3987_v29 = vld [vmem:[#allocation27_spill] sm:$0xff]  ;;  %v205_v6 = vadd.f32 %v3999_v5, %v3218_v35 }
 0x163   :  { %952 = vmatpush1.msra.mxu0 %v2882_v30  ;;  %1023 = vmatpush1.msra.mxu1 %v3032_v7  ;;  %v3988_v30 = vld [vmem:[#allocation18_spill] sm:$0xff]  ;;  %v3439_v5 = vld [vmem:[#allocation6 + $0xe0] sm:$0xff] }
 0x164   :  { %953 = vmatprep.subr.mxu0 %v2885_v31  ;;  %1024 = vmatprep.subr.mxu1 %v3036_v8  ;;  %v3989_v31 = vld [vmem:[#allocation28_spill] sm:$0xff]  ;;  %v207_v8 = vadd.f32 %v3227_v48, %v3216_v41 }
 0x165   :  { %954 = vmatpush1.msra.mxu0 %v2890_v33  ;;  %1025 = vmatpush1.msra.mxu1 %v3040_v9  ;;  %v3990_v33 = vld [vmem:[#allocation19_spill] sm:$0xff] }
 0x166   :  { %955 = vmatprep.subr.mxu0 %v3976_v11  ;;  %1026 = vmatprep.subr.mxu1 %v3044_v14 }
 0x167   :  { %956 = vmatpush1.msra.mxu0 %v3977_v12  ;;  %1027 = vmatpush1.msra.mxu1 %v3049_v18 }
 0x168   :  { %957 = vmatprep.subr.mxu0 %v3978_v13  ;;  %1028 = vmatprep.subr.mxu1 %v3053_v20 }
 0x169   :  { %958 = vmatpush1.msra.mxu0 %v2910_v40  ;;  %1029 = vmatpush1.msra.mxu1 %v3057_v21  ;;  %v3991_v40 = vld [vmem:[#allocation29_spill] sm:$0xff] }
 0x16a   :  { %959 = vmatprep.subr.mxu0 %v2919_v43  ;;  %1030 = vmatprep.subr.mxu1 %v3061_v25  ;;  %v3992_v43 = vld [vmem:[#allocation20_spill] sm:$0xff] }
 0x16b   :  { %960 = vmatpush1.msra.mxu0 %v2922_v44  ;;  %1031 = vmatpush1.msra.mxu1 %v3065_v27  ;;  %v3993_v44 = vld [vmem:[#allocation30_spill] sm:$0xff] }
 0x16c   :  { %961 = vmatprep.subr.mxu0 %v2925_v45  ;;  %1032 = vmatprep.subr.mxu1 %v3069_v28  ;;  %v3994_v45 = vld [vmem:[#allocation21_spill] sm:$0xff] }
 0x16d   :  { %962 = vmatpush1.msra.mxu0 %v2930_v46  ;;  %1033 = vmatpush1.msra.mxu1 %v3979_v15  ;;  %v3995_v46 = vmov 0.0   ;;  %v4000_v28 = vld [vmem:[#allocation33_spill] sm:$0xff]  ;;  %v3387_v15 = vld [vmem:[#allocation6 + $0x168] sm:$0xff] }
 0x16e   :  { %963 = vmatprep.subr.mxu0 %v3980_v16  ;;  %1034 = vmatprep.subr.mxu1 %v3981_v17  ;;  %v3389_v16 = vld [vmem:[#allocation6 + $0x178] sm:$0xff]  ;;  %v3393_v17 = vld [vmem:[#allocation6 + $0x160] sm:$0xff]  ;;  %4023 = vst [vmem:[#allocation33_spill] sm:$0xff] %v3523_v56 }
 0x16f   :  { %964 = vmatpush1.msra.mxu0 %v3982_v19  ;;  %1035 = vmatpush1.msra.mxu1 %v3983_v22  ;;  %v3395_v19 = vld [vmem:[#allocation6 + $0x170] sm:$0xff]  ;;  %v3399_v22 = vld [vmem:[#allocation6 + $0x148] sm:$0xff] }
 0x170   :  { %965 = vmatprep.subr.mxu0 %v3984_v23  ;;  %1036 = vmatprep.subr.mxu1 %v3985_v24  ;;  %v3401_v23 = vld [vmem:[#allocation6 + $0x158] sm:$0xff]  ;;  %v3405_v24 = vld [vmem:[#allocation6 + $0x140] sm:$0xff] }
 0x171   :  { %966 = vmatpush1.msra.mxu0 %v3986_v26  ;;  %1037 = vmatpush1.msra.mxu1 %v3987_v29  ;;  %v3407_v26 = vld [vmem:[#allocation6 + $0x150] sm:$0xff]  ;;  %v3411_v29 = vld [vmem:[#allocation6 + $0x128] sm:$0xff] }
 0x172   :  { %967 = vmatprep.subr.mxu0 %v3988_v30  ;;  %1038 = vmatprep.subr.mxu1 %v3989_v31  ;;  %v3413_v30 = vld [vmem:[#allocation6 + $0x138] sm:$0xff]  ;;  %v3417_v31 = vld [vmem:[#allocation6 + $0x120] sm:$0xff] }
 0x173   :  { %968 = vmatpush1.msra.mxu0 %v3990_v33  ;;  %1039 = vmatpush1.msra.mxu1 %v3991_v40  ;;  %v3419_v33 = vld [vmem:[#allocation6 + $0x130] sm:$0xff]  ;;  %v3423_v40 = vld [vmem:[#allocation6 + $0x108] sm:$0xff] }
 0x174   :  { %969 = vmatprep.subr.mxu0 %v3992_v43  ;;  %1040 = vmatprep.subr.mxu1 %v3993_v44  ;;  %v3425_v43 = vld [vmem:[#allocation6 + $0x118] sm:$0xff]  ;;  %v3427_v44 = vld [vmem:[#allocation6 + $0x100] sm:$0xff] }
 0x175   :  { %970 = vmatpush1.msra.mxu0 %v3994_v45  ;;  %1003 = vmatprep.mubr.f32.mxu0 %v3995_v46  ;;  %v3431_v45 = vld [vmem:[#allocation6 + $0x110] sm:$0xff] }
 0x176   :  { %1041 = vmatpush1.msra.mxu1 %v3996_v2  ;;  %1074 = vmatprep.mubr.f32.mxu1 %v3995_v46  ;;  %v3433_v2 = vld [vmem:[#allocation6 + $0xe8] sm:$0xff] }
 0x177   :  { %1251 = vmatprep.subr.mxu1 %v3997_v3  ;;  %v3435_v3 = vld [vmem:[#allocation6 + $0xf8] sm:$0xff] }
 0x216   :  { %v764_v7 = vpop.f32.mrf.mxu0  ;;  %v835_v21 = vpop.f32.mrf.mxu1 }
 0x217   :  { %v840_v9 = vadd.f32 %v764_v7, %v205_v6  ;;  %v842_v47 = vadd.f32 %v835_v21, %v4001_v34  ;;  %v3441_v6 = vld [vmem:[#allocation6 + $0xf0] sm:$0xff]  ;;  %v3443_v7 = vld [vmem:[#allocation6 + $0xc8] sm:$0xff]  ;;  %v3461_v21 = vld [vmem:[#allocation6 + $0xa0] sm:$0xff] }
 0x218   :  { %v766_v14 = vpop.f32.mrf.mxu0  ;;  %v837_v27 = vpop.f32.mrf.mxu1  ;;  %v3475_v34 = vld [vmem:[#allocation6 + $0x90] sm:$0xff] }
 0x219   :  { %v2478_v18 = vmul.f32 -1.442695, %v840_v9  ;;  %v841_v20 = vadd.f32 %v766_v14, %v207_v8  ;;  %v843_v52 = vadd.f32 %v837_v27, %v4000_v28  ;;  %v3447_v8 = vld [vmem:[#allocation6 + $0xd8] sm:$0xff]  ;;  %v3449_v9 = vld [vmem:[#allocation6 + $0xc0] sm:$0xff]  ;;  %v3451_v14 = vld [vmem:[#allocation6 + $0xd0] sm:$0xff]  ;;  %4007 = vst [vmem:[#allocation15_spill] sm:$0xff] %v3475_v34 }
 0x21a   :  { %v3467_v27 = vld [vmem:[#allocation6 + $0x88] sm:$0xff]  ;;  %v3469_v28 = vld [vmem:[#allocation6 + $0x98] sm:$0xff] }
 0x21b   :  { %2591 = vpow2.f32 %v2478_v18  ;;  %v2479_v25 = vmul.f32 -1.442695, %v841_v20  ;;  %v2480_v32 = vmul.f32 -1.442695, %v843_v52  ;;  %v3455_v18 = vld [vmem:[#allocation6 + $0xa8] sm:$0xff]  ;;  %v3457_v20 = vld [vmem:[#allocation6 + $0xb8] sm:$0xff] }
 0x21c   :  { %4004 = vst [vmem:[#allocation23_spill] sm:$0xff] %v3457_v20  ;;  %4006 = vst [vmem:[#allocation24_spill] sm:$0xff] %v3469_v28  ;;  %v3473_v52 = vld [vmem:[#allocation6 + $0x80] sm:$0xff] }
 0x21d   :  { %2593 = vpow2.f32 %v2479_v25  ;;  %v3463_v25 = vld [vmem:[#allocation6 + $0xb0] sm:$0xff] }
 0x21e   :  { %2595 = vtanh.f32 %v842_v47  ;;  %4005 = vst [vmem:[#allocation14_spill] sm:$0xff] %v3463_v25  ;;  %v3479_v47 = vld [vmem:[#allocation6 + $0x68] sm:$0xff] }
 0x21f   :  { %2597 = vpow2.f32 %v2480_v32  ;;  %4008 = vst [vmem:[#allocation25_spill] sm:$0xff] %v3479_v47  ;;  %v3481_v32 = vld [vmem:[#allocation6 + $0x78] sm:$0xff] }
 0x220   :  { %4009 = vst [vmem:[#allocation16_spill] sm:$0xff] %v3481_v32 }
 0x228   :  { %v2592_v10 = vpop.eup %2591 }
 0x229   :  { %v847_v35 = vadd.f32 1.0, %v2592_v10  ;;  %v3485_v10 = vld [vmem:[#allocation6 + $0x60] sm:$0xff] }
 0x22a   :  { %v2594_v57 = vpop.eup %2593  ;;  %4010 = vst [vmem:[#allocation26_spill] sm:$0xff] %v3485_v10 }
 0x22b   :  { %2599 = vrcp.f32 %v847_v35  ;;  %v853_v48 = vadd.f32 1.0, %v2594_v57  ;;  %v2596_v36 = vpop.eup %2595  ;;  %v3487_v35 = vld [vmem:[#allocation6 + $0x70] sm:$0xff]  ;;  %v3491_v57 = vld [vmem:[#allocation6 + $0x48] sm:$0xff] }
 0x22c   :  { %v2598_v53 = vpop.eup %2597  ;;  %4011 = vst [vmem:[#allocation17_spill] sm:$0xff] %v3487_v35  ;;  %4012 = vst [vmem:[#allocation27_spill] sm:$0xff] %v3491_v57 }
 0x22d   :  { %2601 = vrcp.f32 %v853_v48  ;;  %v860_v51 = vadd.f32 1.0, %v2598_v53  ;;  %v3493_v48 = vld [vmem:[#allocation6 + $0x58] sm:$0xff]  ;;  %v3499_v53 = vld [vmem:[#allocation6 + $0x50] sm:$0xff] }
 0x22e   :  { %4013 = vst [vmem:[#allocation18_spill] sm:$0xff] %v3493_v48  ;;  %4015 = vst [vmem:[#allocation19_spill] sm:$0xff] %v3499_v53 }
 0x22f   :  { %2603 = vrcp.f32 %v860_v51  ;;  %v3511_v51 = vld [vmem:[#allocation6 + $0x30] sm:$0xff] }
 0x230   :  { %4019 = vst [vmem:[#allocation21_spill] sm:$0xff] %v3511_v51 }
 0x238   :  { %v2600_v0 = vpop.eup %2599 }
 0x239   :  { %v864_v54 = vmul.f32 %v2600_v0, %v2596_v36  ;;  %v3497_v36 = vld [vmem:[#allocation6 + $0x40] sm:$0xff]  ;;  %v3503_v0 = vld [vmem:[#allocation6 + $0x28] sm:$0xff] }
 0x23a   :  { %v2602_v49 = vpop.eup %2601  ;;  %4014 = vst [vmem:[#allocation28_spill] sm:$0xff] %v3497_v36  ;;  %4016 = vst [vmem:[#allocation29_spill] sm:$0xff] %v3503_v0 }
 0x23b   :  { %v863_v39 = vmul.f32 %v2602_v49, %v3266_v37  ;;  %v3363_v37 = vld [vmem:[#allocation6 + $0x1e8] sm:$0xff]  ;;  %v3509_v49 = vld [vmem:[#allocation6 + $0x20] sm:$0xff] }
 0x23c   :  { %v2604_v11 = vpop.eup %2603  ;;  %4003 = vst [vmem:[#allocation13_spill] sm:$0xff] %v3363_v37  ;;  %1180 = vmatprep.subr.mxu0 %v3363_v37  ;;  %4018 = vst [vmem:[#allocation30_spill] sm:$0xff] %v3509_v49 }
 0x23d   :  { %v3347_v50 = vadd.f32 %v864_v54, %v863_v39  ;;  %v3505_v54 = vld [vmem:[#allocation6 + $0x38] sm:$0xff]  ;;  %v3515_v39 = vld [vmem:[#allocation6 + $0x8] sm:$0xff] }
 0x23e   :  { %4017 = vst [vmem:[#allocation20_spill] sm:$0xff] %v3505_v54  ;;  %4020 = vst [vmem:[#allocation31_spill] sm:$0xff] %v3515_v39 }
 0x23f   :  { %2605 = vtanh.f32 %v3347_v50 }
 0x24c   :  { %v2606_v12 = vpop.eup %2605 }
 0x24d   :  { %v3350_v13 = vmul.f32 %v2606_v12, %v2604_v11  ;;  %v3517_v11 = vld [vmem:[#allocation6 + $0x18] sm:$0xff]  ;;  %v3521_v12 = vld [vmem:[#allocation6] sm:$0xff] }
 0x24e   :  { %4021 = vst [vmem:[#allocation22_spill] sm:$0xff] %v3517_v11  ;;  %4022 = vst [vmem:[#allocation47_spill] sm:$0xff] %v3521_v12 }
 0x24f   :  { %4002 = vst [vmem:[#allocation12_spill] sm:$0xff] %v3350_v13  ;;  %1004 = vmatmul.mubr.f32.vlgmr.msra.gmra.mxu0 %v3350_v13  ;;  %1075 = vmatmul.mubr.f32.vlgmr.msra.gmra.mxu1 %v3350_v13 }
 0x250   :  { %1252 = vmatpush1.msra.mxu1 %v2982_v58  ;;  %1244 = vmatprep.mubr.f32.mxu0 %v3995_v46  ;;  %v3366_v58 = vld [vmem:[#allocation6 + $0x1e0] sm:$0xff] }
 0x251   :  { %1253 = vmatprep.subr.mxu1 %v2986_v59  ;;  %1315 = vmatprep.mubr.f32.mxu1 %v3995_v46  ;;  %v3369_v59 = vld [vmem:[#allocation6 + $0x1c8] sm:$0xff] }
 0x252   :  { %1254 = vmatpush1.msra.mxu1 %v2992_v60  ;;  %1181 = vmatpush1.msra.mxu0 %v3366_v58  ;;  %v3372_v60 = vld [vmem:[#allocation6 + $0x1c0] sm:$0xff] }
 0x253   :  { %1255 = vmatprep.subr.mxu1 %v2995_v61  ;;  %1182 = vmatprep.subr.mxu0 %v3369_v59  ;;  %v3375_v61 = vld [vmem:[#allocation6 + $0x1a8] sm:$0xff] }
 0x254   :  { %1256 = vmatpush1.msra.mxu1 %v2999_v62  ;;  %1183 = vmatpush1.msra.mxu0 %v3372_v60  ;;  %v3378_v62 = vld [vmem:[#allocation6 + $0x1a0] sm:$0xff] }
 0x255   :  { %1257 = vmatprep.subr.mxu1 %v3003_v63  ;;  %1184 = vmatprep.subr.mxu0 %v3375_v61  ;;  %v3381_v63 = vld [vmem:[#allocation6 + $0x188] sm:$0xff] }
 0x256   :  { %1258 = vmatpush1.msra.mxu1 %v3007_v1  ;;  %1185 = vmatpush1.msra.mxu0 %v3378_v62  ;;  %v3384_v1 = vld [vmem:[#allocation6 + $0x180] sm:$0xff] }
 0x257   :  { %1186 = vmatprep.subr.mxu0 %v3381_v63  ;;  %1259 = vmatprep.subr.mxu1 %v3389_v16 }
 0x258   :  { %1187 = vmatpush1.msra.mxu0 %v3384_v1  ;;  %1260 = vmatpush1.msra.mxu1 %v3395_v19 }
 0x259   :  { %1188 = vmatprep.subr.mxu0 %v3387_v15  ;;  %1261 = vmatprep.subr.mxu1 %v3401_v23 }
 0x25a   :  { %1189 = vmatpush1.msra.mxu0 %v3393_v17  ;;  %1262 = vmatpush1.msra.mxu1 %v3407_v26 }
 0x25b   :  { %1190 = vmatprep.subr.mxu0 %v3399_v22  ;;  %1263 = vmatprep.subr.mxu1 %v3413_v30 }
 0x25c   :  { %1191 = vmatpush1.msra.mxu0 %v3405_v24  ;;  %1264 = vmatpush1.msra.mxu1 %v3419_v33 }
 0x25d   :  { %1192 = vmatprep.subr.mxu0 %v3411_v29  ;;  %1265 = vmatprep.subr.mxu1 %v3425_v43 }
 0x25e   :  { %1193 = vmatpush1.msra.mxu0 %v3417_v31  ;;  %1266 = vmatpush1.msra.mxu1 %v3431_v45 }
 0x25f   :  { %1194 = vmatprep.subr.mxu0 %v3423_v40  ;;  %1267 = vmatprep.subr.mxu1 %v3435_v3 }
 0x260   :  { %1195 = vmatpush1.msra.mxu0 %v3427_v44  ;;  %1268 = vmatpush1.msra.mxu1 %v3441_v6 }
 0x261   :  { %1196 = vmatprep.subr.mxu0 %v3433_v2  ;;  %1269 = vmatprep.subr.mxu1 %v3447_v8 }
 0x262   :  { %1197 = vmatpush1.msra.mxu0 %v3439_v5  ;;  %1270 = vmatpush1.msra.mxu1 %v3451_v14 }
 0x263   :  { %1198 = vmatprep.subr.mxu0 %v3443_v7  ;;  %1271 = vmatprep.subr.mxu1 %v3457_v20 }
 0x264   :  { %1199 = vmatpush1.msra.mxu0 %v3449_v9  ;;  %1272 = vmatpush1.msra.mxu1 %v3463_v25 }
 0x265   :  { %1200 = vmatprep.subr.mxu0 %v3455_v18  ;;  %1273 = vmatprep.subr.mxu1 %v3469_v28 }
 0x266   :  { %1201 = vmatpush1.msra.mxu0 %v3461_v21  ;;  %1274 = vmatpush1.msra.mxu1 %v3475_v34 }
 0x267   :  { %1202 = vmatprep.subr.mxu0 %v3467_v27  ;;  %1275 = vmatprep.subr.mxu1 %v3481_v32  ;;  %v4026_v32 = vld [vmem:[#allocation34_spill] sm:$0xff] }
 0x268   :  { %1203 = vmatpush1.msra.mxu0 %v3473_v52  ;;  %1276 = vmatpush1.msra.mxu1 %v3487_v35  ;;  %v4025_v35 = vld [vmem:[#allocation35_spill] sm:$0xff] }
 0x269   :  { %1204 = vmatprep.subr.mxu0 %v3479_v47  ;;  %1277 = vmatprep.subr.mxu1 %v3493_v48 }
 0x26a   :  { %1205 = vmatpush1.msra.mxu0 %v3485_v10  ;;  %1278 = vmatpush1.msra.mxu1 %v3499_v53 }
 0x26b   :  { %1206 = vmatprep.subr.mxu0 %v3491_v57  ;;  %1279 = vmatprep.subr.mxu1 %v3505_v54 }
 0x26c   :  { %1207 = vmatpush1.msra.mxu0 %v3497_v36  ;;  %1280 = vmatpush1.msra.mxu1 %v3511_v51 }
 0x26d   :  { %1208 = vmatprep.subr.mxu0 %v3503_v0  ;;  %1281 = vmatprep.subr.mxu1 %v3517_v11 }
 0x26e   :  { %1209 = vmatpush1.msra.mxu0 %v3509_v49  ;;  %1282 = vmatpush1.msra.mxu1 %v3523_v56 }
 0x26f   :  { %1210 = vmatprep.subr.mxu0 %v3515_v39 }
 0x270   :  { %1211 = vmatpush1.msra.mxu0 %v3521_v12 }
 0x271   :  { %1421 = vmatprep.subr.mxu0 %v3363_v37 }
 0x30f   :  { %v1005_v4 = vpop.f32.mrf.mxu0  ;;  %v1076_v53 = vpop.f32.mrf.mxu1 }
 0x310   :  { %v1081_v41 = vadd.f32 %v1005_v4, %v3230_v42  ;;  %v1083_v34 = vadd.f32 %v1076_v53, %v4026_v32  ;;  %v3593_v53 = vld [vmem:[#allocation6 + $0x1b0] sm:$0xff] }
 0x311   :  { %v1007_v13 = vpop.f32.mrf.mxu0  ;;  %v1078_v48 = vpop.f32.mrf.mxu1 }
 0x312   :  { %v2481_v38 = vmul.f32 -1.442695, %v1081_v41  ;;  %v1082_v54 = vadd.f32 %v1007_v13, %v4024_v55  ;;  %v1084_v11 = vadd.f32 %v1078_v48, %v4025_v35  ;;  %v3590_v48 = vld [vmem:[#allocation6 + $0x1b8] sm:$0xff] }
 0x314   :  { %2607 = vpow2.f32 %v2481_v38  ;;  %v2482_v51 = vmul.f32 -1.442695, %v1082_v54  ;;  %v2483_v28 = vmul.f32 -1.442695, %v1084_v11  ;;  %v3596_v11 = vld [vmem:[#allocation6 + $0x198] sm:$0xff] }
 0x316   :  { %2609 = vpow2.f32 %v2482_v51 }
 0x317   :  { %2611 = vtanh.f32 %v1083_v34 }
 0x318   :  { %2613 = vpow2.f32 %v2483_v28  ;;  %v3587_v28 = vld [vmem:[#allocation6 + $0x1d0] sm:$0xff] }
 0x321   :  { %v2608_v56 = vpop.eup %2607 }
 0x322   :  { %v1088_v25 = vadd.f32 1.0, %v2608_v56 }
 0x323   :  { %v2610_v20 = vpop.eup %2609 }
 0x324   :  { %2615 = vrcp.f32 %v1088_v25  ;;  %v1094_v42 = vadd.f32 1.0, %v2610_v20  ;;  %v2612_v41 = vpop.eup %2611  ;;  %v3581_v20 = vld [vmem:[#allocation6 + $0x1f0] sm:$0xff]  ;;  %v3584_v25 = vld [vmem:[#allocation6 + $0x1d8] sm:$0xff] }
 0x325   :  { %v2614_v55 = vpop.eup %2613 }
 0x326   :  { %2617 = vrcp.f32 %v1094_v42  ;;  %v1101_v54 = vadd.f32 1.0, %v2614_v55  ;;  %v3599_v42 = vld [vmem:[#allocation6 + $0x190] sm:$0xff]  ;;  %v4030_v55 = vld [vmem:[#allocation14_spill] sm:$0xff] }
 0x328   :  { %2619 = vrcp.f32 %v1101_v54  ;;  %v4034_v54 = vld [vmem:[#allocation17_spill] sm:$0xff] }
 0x331   :  { %v2616_v38 = vpop.eup %2615 }
 0x332   :  { %v1105_v4 = vmul.f32 %v2616_v38, %v2612_v41  ;;  %v4029_v41 = vld [vmem:[#allocation23_spill] sm:$0xff]  ;;  %v4031_v38 = vld [vmem:[#allocation24_spill] sm:$0xff] }
 0x333   :  { %v2618_v13 = vpop.eup %2617 }
 0x334   :  { %v1104_v51 = vmul.f32 %v2618_v13, %v3347_v50  ;;  %v3578_v50 = vld [vmem:[#allocation6 + $0x1f8] sm:$0xff]  ;;  %v4033_v13 = vld [vmem:[#allocation16_spill] sm:$0xff] }
 0x335   :  { %v2620_v56 = vpop.eup %2619  ;;  %4028 = vst [vmem:[#allocation48_spill] sm:$0xff] %v3578_v50  ;;  %1492 = vmatprep.subr.mxu1 %v3578_v50 }
 0x336   :  { %v3537_v35 = vadd.f32 %v1105_v4, %v1104_v51  ;;  %v4032_v4 = vld [vmem:[#allocation15_spill] sm:$0xff]  ;;  %v4035_v51 = vld [vmem:[#allocation18_spill] sm:$0xff] }
 0x338   :  { %2621 = vtanh.f32 %v3537_v35 }
 0x345   :  { %v2622_v34 = vpop.eup %2621 }
 0x346   :  { %v3540_v32 = vmul.f32 %v2622_v34, %v2620_v56  ;;  %v4036_v56 = vld [vmem:[#allocation19_spill] sm:$0xff]  ;;  %v4037_v34 = vld [vmem:[#allocation20_spill] sm:$0xff] }
 0x348   :  { %4027 = vst [vmem:[#allocation32_spill] sm:$0xff] %v3540_v32  ;;  %1245 = vmatmul.mubr.f32.vlgmr.msra.gmra.mxu0 %v3540_v32  ;;  %1316 = vmatmul.mubr.f32.vlgmr.msra.gmra.mxu1 %v3540_v32  ;;  %v4038_v32 = vld [vmem:[#allocation21_spill] sm:$0xff] }
 0x349   :  { %1422 = vmatpush1.msra.mxu0 %v3366_v58  ;;  %1485 = vmatprep.mubr.f32.mxu0 %v3995_v46 }
 0x34a   :  { %1423 = vmatprep.subr.mxu0 %v3369_v59  ;;  %1556 = vmatprep.mubr.f32.mxu1 %v3995_v46  ;;  %v4040_v46 = vld [vmem:[#allocation33_spill] sm:$0xff] }
 0x34b   :  { %1424 = vmatpush1.msra.mxu0 %v3372_v60  ;;  %1493 = vmatpush1.msra.mxu1 %v3581_v20 }
 0x34c   :  { %1425 = vmatprep.subr.mxu0 %v3375_v61  ;;  %1494 = vmatprep.subr.mxu1 %v3584_v25 }
 0x34d   :  { %1426 = vmatpush1.msra.mxu0 %v3378_v62  ;;  %1495 = vmatpush1.msra.mxu1 %v3587_v28 }
 0x34e   :  { %1427 = vmatprep.subr.mxu0 %v3381_v63  ;;  %1496 = vmatprep.subr.mxu1 %v3590_v48 }
 0x34f   :  { %1428 = vmatpush1.msra.mxu0 %v3384_v1  ;;  %1497 = vmatpush1.msra.mxu1 %v3593_v53 }
 0x350   :  { %1429 = vmatprep.subr.mxu0 %v3387_v15  ;;  %1498 = vmatprep.subr.mxu1 %v3596_v11 }
 0x351   :  { %1430 = vmatpush1.msra.mxu0 %v3393_v17  ;;  %1499 = vmatpush1.msra.mxu1 %v3599_v42 }
 0x352   :  { %1431 = vmatprep.subr.mxu0 %v3399_v22  ;;  %1500 = vmatprep.subr.mxu1 %v3389_v16 }
 0x353   :  { %1432 = vmatpush1.msra.mxu0 %v3405_v24  ;;  %1501 = vmatpush1.msra.mxu1 %v3395_v19 }
 0x354   :  { %1433 = vmatprep.subr.mxu0 %v3411_v29  ;;  %1502 = vmatprep.subr.mxu1 %v3401_v23 }
 0x355   :  { %1434 = vmatpush1.msra.mxu0 %v3417_v31  ;;  %1503 = vmatpush1.msra.mxu1 %v3407_v26 }
 0x356   :  { %1435 = vmatprep.subr.mxu0 %v3423_v40  ;;  %1504 = vmatprep.subr.mxu1 %v3413_v30 }
 0x357   :  { %1436 = vmatpush1.msra.mxu0 %v3427_v44  ;;  %1505 = vmatpush1.msra.mxu1 %v3419_v33 }
 0x358   :  { %1437 = vmatprep.subr.mxu0 %v3433_v2  ;;  %1506 = vmatprep.subr.mxu1 %v3425_v43 }
 0x359   :  { %1438 = vmatpush1.msra.mxu0 %v3439_v5  ;;  %1507 = vmatpush1.msra.mxu1 %v3431_v45 }
 0x35a   :  { %1439 = vmatprep.subr.mxu0 %v3443_v7  ;;  %1508 = vmatprep.subr.mxu1 %v3435_v3 }
 0x35b   :  { %1440 = vmatpush1.msra.mxu0 %v3449_v9  ;;  %1509 = vmatpush1.msra.mxu1 %v3441_v6 }
 0x35c   :  { %1441 = vmatprep.subr.mxu0 %v3455_v18  ;;  %1510 = vmatprep.subr.mxu1 %v3447_v8 }
 0x35d   :  { %1442 = vmatpush1.msra.mxu0 %v3461_v21  ;;  %1511 = vmatpush1.msra.mxu1 %v3451_v14 }
 0x35e   :  { %1443 = vmatprep.subr.mxu0 %v3467_v27  ;;  %1512 = vmatprep.subr.mxu1 %v4029_v41 }
 0x35f   :  { %1444 = vmatpush1.msra.mxu0 %v3473_v52  ;;  %1513 = vmatpush1.msra.mxu1 %v4030_v55 }
 0x360   :  { %1445 = vmatprep.subr.mxu0 %v3479_v47  ;;  %1514 = vmatprep.subr.mxu1 %v4031_v38 }
 0x361   :  { %1446 = vmatpush1.msra.mxu0 %v3485_v10  ;;  %1515 = vmatpush1.msra.mxu1 %v4032_v4  ;;  %v4043_v10 = vld [vmem:[#allocation37_spill] sm:$0xff] }
 0x362   :  { %1447 = vmatprep.subr.mxu0 %v3491_v57  ;;  %1516 = vmatprep.subr.mxu1 %v4033_v13  ;;  %v4042_v57 = vld [vmem:[#allocation50_spill] sm:$0xff]  ;;  %v4044_v13 = vld [vmem:[#allocation36_spill] sm:$0xff] }
 0x363   :  { %1448 = vmatpush1.msra.mxu0 %v3497_v36  ;;  %1517 = vmatpush1.msra.mxu1 %v4034_v54 }
 0x364   :  { %1449 = vmatprep.subr.mxu0 %v3503_v0  ;;  %1518 = vmatprep.subr.mxu1 %v4035_v51 }
 0x365   :  { %1450 = vmatpush1.msra.mxu0 %v3509_v49  ;;  %1519 = vmatpush1.msra.mxu1 %v4036_v56 }
 0x366   :  { %1451 = vmatprep.subr.mxu0 %v3515_v39  ;;  %1520 = vmatprep.subr.mxu1 %v4037_v34  ;;  %v4041_v39 = vld [vmem:[#allocation49_spill] sm:$0xff] }
 0x367   :  { %1452 = vmatpush1.msra.mxu0 %v3521_v12  ;;  %1521 = vmatpush1.msra.mxu1 %v4038_v32 }
 0x368   :  { %1662 = vmatprep.subr.mxu0 %v3363_v37  ;;  %v4039_v37 = vld [vmem:[#allocation22_spill] sm:$0xff] }
 0x369   :  { %1522 = vmatprep.subr.mxu1 %v4039_v37 }
 0x36a   :  { %1523 = vmatpush1.msra.mxu1 %v4040_v46 }
 0x36b   :  { %1733 = vmatprep.subr.mxu1 %v3578_v50 }
 0x408   :  { %v1246_v12 = vpop.f32.mrf.mxu0  ;;  %v1317_v51 = vpop.f32.mrf.mxu1 }
 0x409   :  { %v1322_v49 = vadd.f32 %v1246_v12, %v4041_v39  ;;  %v1324_v37 = vadd.f32 %v1317_v51, %v4044_v13  ;;  %v4050_v13 = vld [vmem:[#allocation17_spill] sm:$0xff]  ;;  %v4051_v51 = vld [vmem:[#allocation27_spill] sm:$0xff] }
 0x40a   :  { %v1248_v0 = vpop.f32.mrf.mxu0  ;;  %v1319_v34 = vpop.f32.mrf.mxu1 }
 0x40b   :  { %v2484_v36 = vmul.f32 -1.442695, %v1322_v49  ;;  %v1323_v54 = vadd.f32 %v1248_v0, %v4042_v57  ;;  %v1325_v32 = vadd.f32 %v1319_v34, %v4043_v10  ;;  %v4052_v34 = vld [vmem:[#allocation18_spill] sm:$0xff] }
 0x40d   :  { %2623 = vpow2.f32 %v2484_v36  ;;  %v2485_v56 = vmul.f32 -1.442695, %v1323_v54  ;;  %v2486_v47 = vmul.f32 -1.442695, %v1325_v32 }
 0x40f   :  { %2625 = vpow2.f32 %v2485_v56 }
 0x410   :  { %2627 = vtanh.f32 %v1324_v37 }
 0x411   :  { %2629 = vpow2.f32 %v2486_v47  ;;  %v4046_v47 = vld [vmem:[#allocation15_spill] sm:$0xff] }
 0x41a   :  { %v2624_v46 = vpop.eup %2623 }
 0x41b   :  { %v1329_v4 = vadd.f32 1.0, %v2624_v46 }
 0x41c   :  { %v2626_v50 = vpop.eup %2625 }
 0x41d   :  { %2631 = vrcp.f32 %v1329_v4  ;;  %v1335_v39 = vadd.f32 1.0, %v2626_v50  ;;  %v2628_v49 = vpop.eup %2627  ;;  %v4048_v50 = vld [vmem:[#allocation16_spill] sm:$0xff]  ;;  %v4049_v4 = vld [vmem:[#allocation26_spill] sm:$0xff] }
 0x41e   :  { %v2630_v57 = vpop.eup %2629 }
 0x41f   :  { %2633 = vrcp.f32 %v1335_v39  ;;  %v1342_v54 = vadd.f32 1.0, %v2630_v57  ;;  %v4053_v39 = vld [vmem:[#allocation28_spill] sm:$0xff]  ;;  %v4055_v57 = vld [vmem:[#allocation29_spill] sm:$0xff] }
 0x421   :  { %2635 = vrcp.f32 %v1342_v54  ;;  %v4059_v54 = vld [vmem:[#allocation31_spill] sm:$0xff] }
 0x42a   :  { %v2632_v36 = vpop.eup %2631 }
 0x42b   :  { %v1346_v0 = vmul.f32 %v2632_v36, %v2628_v49  ;;  %v4054_v49 = vld [vmem:[#allocation19_spill] sm:$0xff]  ;;  %v4056_v36 = vld [vmem:[#allocation20_spill] sm:$0xff] }
 0x42c   :  { %v2634_v12 = vpop.eup %2633 }
 0x42d   :  { %v1345_v56 = vmul.f32 %v2634_v12, %v3537_v35  ;;  %v4047_v35 = vld [vmem:[#allocation25_spill] sm:$0xff] }
 0x42e   :  { %v2636_v46 = vpop.eup %2635  ;;  %v4058_v12 = vld [vmem:[#allocation21_spill] sm:$0xff] }
 0x42f   :  { %v3632_v10 = vadd.f32 %v1346_v0, %v1345_v56  ;;  %v4057_v0 = vld [vmem:[#allocation30_spill] sm:$0xff] }
 0x430   :  { %v4060_v56 = vld [vmem:[#allocation22_spill] sm:$0xff] }
 0x431   :  { %2637 = vtanh.f32 %v3632_v10 }
 0x43e   :  { %v2638_v37 = vpop.eup %2637 }
 0x43f   :  { %v3635_v32 = vmul.f32 %v2638_v37, %v2636_v46  ;;  %v4061_v46 = vld [vmem:[#allocation47_spill] sm:$0xff]  ;;  %v4062_v37 = vmov 0.0  }
 0x441   :  { %4045 = vst [vmem:[#allocation35_spill] sm:$0xff] %v3635_v32  ;;  %1486 = vmatmul.mubr.f32.vlgmr.msra.gmra.mxu0 %v3635_v32  ;;  %1557 = vmatmul.mubr.f32.vlgmr.msra.gmra.mxu1 %v3635_v32  ;;  %v4063_v32 = vld [vmem:[#allocation33_spill] sm:$0xff] }
 0x442   :  { %1663 = vmatpush1.msra.mxu0 %v3366_v58  ;;  %1734 = vmatpush1.msra.mxu1 %v3581_v20 }
 0x443   :  { %1664 = vmatprep.subr.mxu0 %v3369_v59  ;;  %1735 = vmatprep.subr.mxu1 %v3584_v25 }
 0x444   :  { %1665 = vmatpush1.msra.mxu0 %v3372_v60  ;;  %1736 = vmatpush1.msra.mxu1 %v3587_v28 }
 0x445   :  { %1666 = vmatprep.subr.mxu0 %v3375_v61  ;;  %1737 = vmatprep.subr.mxu1 %v3590_v48 }
 0x446   :  { %1667 = vmatpush1.msra.mxu0 %v3378_v62  ;;  %1738 = vmatpush1.msra.mxu1 %v3593_v53 }
 0x447   :  { %1668 = vmatprep.subr.mxu0 %v3381_v63  ;;  %1739 = vmatprep.subr.mxu1 %v3596_v11 }
 0x448   :  { %1669 = vmatpush1.msra.mxu0 %v3384_v1  ;;  %1740 = vmatpush1.msra.mxu1 %v3599_v42 }
 0x449   :  { %1670 = vmatprep.subr.mxu0 %v3387_v15  ;;  %1741 = vmatprep.subr.mxu1 %v3389_v16 }
 0x44a   :  { %1671 = vmatpush1.msra.mxu0 %v3393_v17  ;;  %1742 = vmatpush1.msra.mxu1 %v3395_v19 }
 0x44b   :  { %1672 = vmatprep.subr.mxu0 %v3399_v22  ;;  %1743 = vmatprep.subr.mxu1 %v3401_v23 }
 0x44c   :  { %1673 = vmatpush1.msra.mxu0 %v3405_v24  ;;  %1744 = vmatpush1.msra.mxu1 %v3407_v26 }
 0x44d   :  { %1674 = vmatprep.subr.mxu0 %v3411_v29  ;;  %1745 = vmatprep.subr.mxu1 %v3413_v30 }
 0x44e   :  { %1675 = vmatpush1.msra.mxu0 %v3417_v31  ;;  %1746 = vmatpush1.msra.mxu1 %v3419_v33 }
 0x44f   :  { %1676 = vmatprep.subr.mxu0 %v3423_v40  ;;  %1747 = vmatprep.subr.mxu1 %v3425_v43 }
 0x450   :  { %1677 = vmatpush1.msra.mxu0 %v3427_v44  ;;  %1748 = vmatpush1.msra.mxu1 %v3431_v45 }
 0x451   :  { %1678 = vmatprep.subr.mxu0 %v3433_v2  ;;  %1749 = vmatprep.subr.mxu1 %v3435_v3 }
 0x452   :  { %1679 = vmatpush1.msra.mxu0 %v3439_v5  ;;  %1750 = vmatpush1.msra.mxu1 %v3441_v6 }
 0x453   :  { %1680 = vmatprep.subr.mxu0 %v3443_v7  ;;  %1751 = vmatprep.subr.mxu1 %v3447_v8 }
 0x454   :  { %1681 = vmatpush1.msra.mxu0 %v3449_v9  ;;  %1752 = vmatpush1.msra.mxu1 %v3451_v14 }
 0x455   :  { %1682 = vmatprep.subr.mxu0 %v3455_v18  ;;  %1753 = vmatprep.subr.mxu1 %v4029_v41 }
 0x456   :  { %1683 = vmatpush1.msra.mxu0 %v3461_v21  ;;  %1754 = vmatpush1.msra.mxu1 %v4030_v55 }
 0x457   :  { %1684 = vmatprep.subr.mxu0 %v3467_v27  ;;  %1755 = vmatprep.subr.mxu1 %v4031_v38 }
 0x458   :  { %1685 = vmatpush1.msra.mxu0 %v3473_v52  ;;  %1756 = vmatpush1.msra.mxu1 %v4046_v47 }
 0x459   :  { %1686 = vmatprep.subr.mxu0 %v4047_v35  ;;  %1757 = vmatprep.subr.mxu1 %v4048_v50  ;;  %v4069_v50 = vld [vmem:[#allocation38_spill] sm:$0xff] }
 0x45a   :  { %1687 = vmatpush1.msra.mxu0 %v4049_v4  ;;  %1758 = vmatpush1.msra.mxu1 %v4050_v13  ;;  %v4068_v4 = vld [vmem:[#allocation39_spill] sm:$0xff] }
 0x45b   :  { %1688 = vmatprep.subr.mxu0 %v4051_v51  ;;  %1759 = vmatprep.subr.mxu1 %v4052_v34 }
 0x45c   :  { %1689 = vmatpush1.msra.mxu0 %v4053_v39  ;;  %1760 = vmatpush1.msra.mxu1 %v4054_v49  ;;  %v4064_v49 = vld [vmem:[#allocation13_spill] sm:$0xff] }
 0x45d   :  { %1690 = vmatprep.subr.mxu0 %v4055_v57  ;;  %1761 = vmatprep.subr.mxu1 %v4056_v36  ;;  %v4065_v57 = vld [vmem:[#allocation48_spill] sm:$0xff] }
 0x45e   :  { %1691 = vmatpush1.msra.mxu0 %v4057_v0  ;;  %1762 = vmatpush1.msra.mxu1 %v4058_v12  ;;  %v4066_v0 = vld [vmem:[#allocation51_spill] sm:$0xff] }
 0x45f   :  { %1692 = vmatprep.subr.mxu0 %v4059_v54  ;;  %1763 = vmatprep.subr.mxu1 %v4060_v56  ;;  %v4067_v54 = vld [vmem:[#allocation52_spill] sm:$0xff] }
 0x460   :  { %1693 = vmatpush1.msra.mxu0 %v4061_v46  ;;  %1726 = vmatprep.mubr.f32.mxu0 %v4062_v37 }
 0x461   :  { %1764 = vmatpush1.msra.mxu1 %v4063_v32  ;;  %1797 = vmatprep.mubr.f32.mxu1 %v4062_v37 }
 0x462   :  { %1903 = vmatprep.subr.mxu0 %v4064_v49  ;;  %1974 = vmatprep.subr.mxu1 %v4065_v57 }
 0x501   :  { %v1487_v36 = vpop.f32.mrf.mxu0  ;;  %v1558_v56 = vpop.f32.mrf.mxu1 }
 0x502   :  { %v1563_v39 = vadd.f32 %v1487_v36, %v4066_v0  ;;  %v1565_v37 = vadd.f32 %v1558_v56, %v4069_v50 }
 0x503   :  { %v1489_v12 = vpop.f32.mrf.mxu0  ;;  %v1560_v13 = vpop.f32.mrf.mxu1 }
 0x504   :  { %v2487_v34 = vmul.f32 -1.442695, %v1563_v39  ;;  %v1564_v51 = vadd.f32 %v1489_v12, %v4067_v54  ;;  %v1566_v32 = vadd.f32 %v1560_v13, %v4068_v4 }
 0x506   :  { %2639 = vpow2.f32 %v2487_v34  ;;  %v2488_v46 = vmul.f32 -1.442695, %v1564_v51  ;;  %v2489_v35 = vmul.f32 -1.442695, %v1566_v32 }
 0x508   :  { %2641 = vpow2.f32 %v2488_v46 }
 0x509   :  { %2643 = vtanh.f32 %v1565_v37 }
 0x50a   :  { %2645 = vpow2.f32 %v2489_v35 }
 0x513   :  { %v2640_v49 = vpop.eup %2639 }
 0x514   :  { %v1570_v47 = vadd.f32 1.0, %v2640_v49 }
 0x515   :  { %v2642_v57 = vpop.eup %2641 }
 0x516   :  { %2647 = vrcp.f32 %v1570_v47  ;;  %v1576_v36 = vadd.f32 1.0, %v2642_v57  ;;  %v2644_v39 = vpop.eup %2643 }
 0x517   :  { %v2646_v0 = vpop.eup %2645 }
 0x518   :  { %2649 = vrcp.f32 %v1576_v36  ;;  %v1583_v54 = vadd.f32 1.0, %v2646_v0 }
 0x51a   :  { %2651 = vrcp.f32 %v1583_v54  ;;  %v2136_v54 = vld [vmem:[#allocation6 + $0x1c0] sm:$0xff] }
 0x523   :  { %v2648_v34 = vpop.eup %2647 }
 0x524   :  { %v1587_v12 = vmul.f32 %v2648_v34, %v2644_v39 }
 0x525   :  { %v2650_v51 = vpop.eup %2649 }
 0x526   :  { %v1586_v46 = vmul.f32 %v2650_v51, %v3632_v10  ;;  %v2140_v51 = vld [vmem:[#allocation6 + $0x1e0] sm:$0xff] }
 0x527   :  { %v2652_v32 = vpop.eup %2651 }
 0x528   :  { %v3710_v4 = vadd.f32 %v1587_v12, %v1586_v46  ;;  %v2141_v12 = vld [vmem:[#allocation6 + $0x1e8] sm:$0xff]  ;;  %v2132_v46 = vld [vmem:[#allocation6 + $0x1a0] sm:$0xff] }
 0x52a   :  { %2653 = vtanh.f32 %v3710_v4 }
 0x537   :  { %v2654_v50 = vpop.eup %2653 }
 0x538   :  { %v3713_v13 = vmul.f32 %v2654_v50, %v2652_v32  ;;  %v2126_v32 = vld [vmem:[#allocation6 + $0x170] sm:$0xff]  ;;  %v2120_v50 = vld [vmem:[#allocation6 + $0x140] sm:$0xff] }
 0x53a   :  { %1727 = vmatmul.mubr.f32.vlgmr.msra.gmra.mxu0 %v3713_v13  ;;  %1798 = vmatmul.mubr.f32.vlgmr.msra.gmra.mxu1 %v3713_v13 }
 0x53b   :  { %1904 = vmatpush1.msra.mxu0 %v3366_v58  ;;  %1975 = vmatpush1.msra.mxu1 %v3581_v20  ;;  %v4070_v58 = vld [vmem:[#allocation15_spill] sm:$0xff] }
 0x53c   :  { %1905 = vmatprep.subr.mxu0 %v3369_v59  ;;  %1976 = vmatprep.subr.mxu1 %v3584_v25  ;;  %v4071_v59 = vld [vmem:[#allocation25_spill] sm:$0xff] }
 0x53d   :  { %1906 = vmatpush1.msra.mxu0 %v3372_v60  ;;  %1977 = vmatpush1.msra.mxu1 %v3587_v28  ;;  %v4072_v60 = vld [vmem:[#allocation16_spill] sm:$0xff] }
 0x53e   :  { %1907 = vmatprep.subr.mxu0 %v3375_v61  ;;  %1978 = vmatprep.subr.mxu1 %v3590_v48  ;;  %v4073_v61 = vld [vmem:[#allocation26_spill] sm:$0xff] }
 0x53f   :  { %1908 = vmatpush1.msra.mxu0 %v3378_v62  ;;  %1979 = vmatpush1.msra.mxu1 %v3593_v53  ;;  %v4074_v62 = vld [vmem:[#allocation17_spill] sm:$0xff] }
 0x540   :  { %1909 = vmatprep.subr.mxu0 %v3381_v63  ;;  %1980 = vmatprep.subr.mxu1 %v3596_v11  ;;  %v4075_v63 = vld [vmem:[#allocation27_spill] sm:$0xff] }
 0x541   :  { %1910 = vmatpush1.msra.mxu0 %v3384_v1  ;;  %1981 = vmatpush1.msra.mxu1 %v3599_v42  ;;  %v4076_v1 = vld [vmem:[#allocation18_spill] sm:$0xff] }
 0x542   :  { %1911 = vmatprep.subr.mxu0 %v3387_v15  ;;  %1982 = vmatprep.subr.mxu1 %v3389_v16  ;;  %v4077_v15 = vld [vmem:[#allocation28_spill] sm:$0xff]  ;;  %v4078_v16 = vld [vmem:[#allocation19_spill] sm:$0xff] }
 0x543   :  { %1912 = vmatpush1.msra.mxu0 %v3393_v17  ;;  %1983 = vmatpush1.msra.mxu1 %v3395_v19  ;;  %v4079_v17 = vld [vmem:[#allocation29_spill] sm:$0xff]  ;;  %v4080_v19 = vld [vmem:[#allocation20_spill] sm:$0xff] }
 0x544   :  { %1913 = vmatprep.subr.mxu0 %v3399_v22  ;;  %1984 = vmatprep.subr.mxu1 %v3401_v23  ;;  %v4081_v22 = vld [vmem:[#allocation30_spill] sm:$0xff]  ;;  %v4082_v23 = vld [vmem:[#allocation21_spill] sm:$0xff] }
 0x545   :  { %1914 = vmatpush1.msra.mxu0 %v3405_v24  ;;  %1985 = vmatpush1.msra.mxu1 %v3407_v26  ;;  %v4083_v24 = vld [vmem:[#allocation31_spill] sm:$0xff]  ;;  %v4084_v26 = vld [vmem:[#allocation22_spill] sm:$0xff] }
 0x546   :  { %1915 = vmatprep.subr.mxu0 %v3411_v29  ;;  %1986 = vmatprep.subr.mxu1 %v3413_v30  ;;  %v4085_v29 = vld [vmem:[#allocation47_spill] sm:$0xff]  ;;  %v4086_v30 = vmov 0.0  }
 0x547   :  { %1916 = vmatpush1.msra.mxu0 %v3417_v31  ;;  %1987 = vmatpush1.msra.mxu1 %v3419_v33  ;;  %v4087_v31 = vld [vmem:[#allocation33_spill] sm:$0xff]  ;;  %v4088_v33 = vld [vmem:[#allocation48_spill] sm:$0xff] }
 0x548   :  { %1917 = vmatprep.subr.mxu0 %v3423_v40  ;;  %1988 = vmatprep.subr.mxu1 %v3425_v43  ;;  %v4089_v43 = vld [vmem:[#allocation53_spill] sm:$0xff] }
 0x549   :  { %1918 = vmatpush1.msra.mxu0 %v3427_v44  ;;  %1989 = vmatpush1.msra.mxu1 %v3431_v45 }
 0x54a   :  { %1919 = vmatprep.subr.mxu0 %v3433_v2  ;;  %1990 = vmatprep.subr.mxu1 %v3435_v3  ;;  %v4090_v3 = vld [vmem:[#allocation54_spill] sm:$0xff] }
 0x54b   :  { %1920 = vmatpush1.msra.mxu0 %v3439_v5  ;;  %1991 = vmatpush1.msra.mxu1 %v3441_v6 }
 0x54c   :  { %1921 = vmatprep.subr.mxu0 %v3443_v7  ;;  %1992 = vmatprep.subr.mxu1 %v3447_v8 }
 0x54d   :  { %1922 = vmatpush1.msra.mxu0 %v3449_v9  ;;  %1993 = vmatpush1.msra.mxu1 %v3451_v14  ;;  %v4091_v9 = vld [vmem:[#allocation41_spill] sm:$0xff] }
 0x54e   :  { %1923 = vmatprep.subr.mxu0 %v3455_v18  ;;  %1994 = vmatprep.subr.mxu1 %v4029_v41  ;;  %v4092_v18 = vld [vmem:[#allocation40_spill] sm:$0xff] }
 0x54f   :  { %1924 = vmatpush1.msra.mxu0 %v3461_v21  ;;  %1995 = vmatpush1.msra.mxu1 %v4030_v55 }
 0x550   :  { %1925 = vmatprep.subr.mxu0 %v3467_v27  ;;  %1996 = vmatprep.subr.mxu1 %v4031_v38 }
 0x551   :  { %1926 = vmatpush1.msra.mxu0 %v3473_v52  ;;  %1997 = vmatpush1.msra.mxu1 %v4070_v58  ;;  %v2123_v58 = vld [vmem:[#allocation6 + $0x158] sm:$0xff] }
 0x552   :  { %1927 = vmatprep.subr.mxu0 %v4071_v59  ;;  %1998 = vmatprep.subr.mxu1 %v4072_v60  ;;  %v2117_v59 = vld [vmem:[#allocation6 + $0x128] sm:$0xff]  ;;  %v2122_v60 = vld [vmem:[#allocation6 + $0x150] sm:$0xff] }
 0x553   :  { %1928 = vmatpush1.msra.mxu0 %v4073_v61  ;;  %1999 = vmatpush1.msra.mxu1 %v4074_v62  ;;  %v2116_v61 = vld [vmem:[#allocation6 + $0x120] sm:$0xff]  ;;  %v2119_v62 = vld [vmem:[#allocation6 + $0x138] sm:$0xff] }
 0x554   :  { %1929 = vmatprep.subr.mxu0 %v4075_v63  ;;  %2000 = vmatprep.subr.mxu1 %v4076_v1  ;;  %v2113_v63 = vld [vmem:[#allocation6 + $0x108] sm:$0xff]  ;;  %v2118_v1 = vld [vmem:[#allocation6 + $0x130] sm:$0xff] }
 0x555   :  { %1930 = vmatpush1.msra.mxu0 %v4077_v15  ;;  %2001 = vmatpush1.msra.mxu1 %v4078_v16  ;;  %v2112_v15 = vld [vmem:[#allocation6 + $0x100] sm:$0xff]  ;;  %v2115_v16 = vld [vmem:[#allocation6 + $0x118] sm:$0xff] }
 0x556   :  { %1931 = vmatprep.subr.mxu0 %v4079_v17  ;;  %2002 = vmatprep.subr.mxu1 %v4080_v19  ;;  %v2109_v17 = vld [vmem:[#allocation6 + $0xe8] sm:$0xff]  ;;  %v2114_v19 = vld [vmem:[#allocation6 + $0x110] sm:$0xff] }
 0x557   :  { %1932 = vmatpush1.msra.mxu0 %v4081_v22  ;;  %2003 = vmatpush1.msra.mxu1 %v4082_v23  ;;  %v2108_v22 = vld [vmem:[#allocation6 + $0xe0] sm:$0xff]  ;;  %v2111_v23 = vld [vmem:[#allocation6 + $0xf8] sm:$0xff] }
 0x558   :  { %1933 = vmatprep.subr.mxu0 %v4083_v24  ;;  %2004 = vmatprep.subr.mxu1 %v4084_v26  ;;  %v2105_v24 = vld [vmem:[#allocation6 + $0xc8] sm:$0xff]  ;;  %v2110_v26 = vld [vmem:[#allocation6 + $0xf0] sm:$0xff] }
 0x559   :  { %1934 = vmatpush1.msra.mxu0 %v4085_v29  ;;  %1967 = vmatprep.mubr.f32.mxu0 %v4086_v30  ;;  %v2104_v29 = vld [vmem:[#allocation6 + $0xc0] sm:$0xff] }
 0x55a   :  { %2005 = vmatpush1.msra.mxu1 %v4087_v31  ;;  %2038 = vmatprep.mubr.f32.mxu1 %v4086_v30  ;;  %v2101_v31 = vld [vmem:[#allocation6 + $0xa8] sm:$0xff] }
 0x55b   :  { %2215 = vmatprep.subr.mxu1 %v4088_v33  ;;  %2144 = vmatprep.subr.mxu0 %v2141_v12  ;;  %v2106_v33 = vld [vmem:[#allocation6 + $0xd0] sm:$0xff] }
 0x5fa   :  { %v1728_v40 = vpop.f32.mrf.mxu0  ;;  %v1799_v6 = vpop.f32.mrf.mxu1 }
 0x5fb   :  { %v1804_v44 = vadd.f32 %v1728_v40, %v4089_v43  ;;  %v1806_v21 = vadd.f32 %v1799_v6, %v4092_v18  ;;  %v2100_v40 = vld [vmem:[#allocation6 + $0xa0] sm:$0xff]  ;;  %v2103_v43 = vld [vmem:[#allocation6 + $0xb8] sm:$0xff]  ;;  %v2098_v6 = vld [vmem:[#allocation6 + $0x90] sm:$0xff] }
 0x5fc   :  { %v1730_v45 = vpop.f32.mrf.mxu0  ;;  %v1801_v8 = vpop.f32.mrf.mxu1  ;;  %v2088_v18 = vld [vmem:[#allocation6 + $0x40] sm:$0xff] }
 0x5fd   :  { %v2490_v2 = vmul.f32 -1.442695, %v1804_v44  ;;  %v1805_v5 = vadd.f32 %v1730_v45, %v4090_v3  ;;  %v1807_v14 = vadd.f32 %v1801_v8, %v4091_v9  ;;  %v2097_v44 = vld [vmem:[#allocation6 + $0x88] sm:$0xff]  ;;  %v2102_v45 = vld [vmem:[#allocation6 + $0xb0] sm:$0xff]  ;;  %v2099_v3 = vld [vmem:[#allocation6 + $0x98] sm:$0xff] }
 0x5fe   :  { %v2095_v8 = vld [vmem:[#allocation6 + $0x78] sm:$0xff]  ;;  %v2089_v9 = vld [vmem:[#allocation6 + $0x48] sm:$0xff] }
 0x5ff   :  { %2655 = vpow2.f32 %v2490_v2  ;;  %v2491_v7 = vmul.f32 -1.442695, %v1805_v5  ;;  %v2492_v27 = vmul.f32 -1.442695, %v1807_v14  ;;  %v2096_v2 = vld [vmem:[#allocation6 + $0x80] sm:$0xff]  ;;  %v2093_v5 = vld [vmem:[#allocation6 + $0x68] sm:$0xff] }
 0x600   :  { %v2094_v14 = vld [vmem:[#allocation6 + $0x70] sm:$0xff] }
 0x601   :  { %2657 = vpow2.f32 %v2491_v7  ;;  %v2092_v7 = vld [vmem:[#allocation6 + $0x60] sm:$0xff] }
 0x602   :  { %2659 = vtanh.f32 %v1806_v21  ;;  %v2091_v21 = vld [vmem:[#allocation6 + $0x58] sm:$0xff] }
 0x603   :  { %2661 = vpow2.f32 %v2492_v27  ;;  %v2085_v27 = vld [vmem:[#allocation6 + $0x28] sm:$0xff] }
 0x60c   :  { %v2656_v52 = vpop.eup %2655 }
 0x60d   :  { %v1811_v41 = vadd.f32 1.0, %v2656_v52  ;;  %v2090_v52 = vld [vmem:[#allocation6 + $0x50] sm:$0xff] }
 0x60e   :  { %v2658_v55 = vpop.eup %2657 }
 0x60f   :  { %2663 = vrcp.f32 %v1811_v41  ;;  %v1817_v38 = vadd.f32 1.0, %v2658_v55  ;;  %v2660_v10 = vpop.eup %2659  ;;  %v2084_v41 = vld [vmem:[#allocation6 + $0x20] sm:$0xff]  ;;  %v2087_v55 = vld [vmem:[#allocation6 + $0x38] sm:$0xff] }
 0x610   :  { %v2662_v47 = vpop.eup %2661 }
 0x611   :  { %2665 = vrcp.f32 %v1817_v38  ;;  %v1824_v37 = vadd.f32 1.0, %v2662_v47  ;;  %v2081_v38 = vld [vmem:[#allocation6 + $0x8] sm:$0xff]  ;;  %v2080_v47 = vld [vmem:[#allocation6] sm:$0xff] }
 0x613   :  { %2667 = vrcp.f32 %v1824_v37 }
 0x61c   :  { %v2664_v35 = vpop.eup %2663 }
 0x61d   :  { %v1828_v57 = vmul.f32 %v2664_v35, %v2660_v10  ;;  %v2086_v10 = vld [vmem:[#allocation6 + $0x30] sm:$0xff]  ;;  %v2083_v35 = vld [vmem:[#allocation6 + $0x18] sm:$0xff] }
 0x61e   :  { %v2666_v56 = vpop.eup %2665 }
 0x61f   :  { %v1827_v49 = vmul.f32 %v2666_v56, %v3710_v4  ;;  %v2121_v4 = vld [vmem:[#allocation6 + $0x148] sm:$0xff]  ;;  %v2339_v56 = vld [vmem:[#allocation8 + $0x78] sm:$0xff] }
 0x620   :  { %v2668_v39 = vpop.eup %2667 }
 0x621   :  { %v3787_v36 = vadd.f32 %v1828_v57, %v1827_v49  ;;  %v2082_v57 = vld [vmem:[#allocation6 + $0x10] sm:$0xff]  ;;  %v4093_v49 = vld [vmem:[#allocation55_spill] sm:$0xff] }
 0x623   :  { %2669 = vtanh.f32 %v3787_v36 }
 0x630   :  { %v2670_v0 = vpop.eup %2669 }
 0x631   :  { %v3790_v34 = vmul.f32 %v2670_v0, %v2668_v39 }
 0x633   :  { %1968 = vmatmul.mubr.f32.vlgmr.msra.gmra.mxu0 %v3790_v34  ;;  %2039 = vmatmul.mubr.f32.vlgmr.msra.gmra.mxu1 %v3790_v34 }
 0x634   :  { %2216 = vmatpush1.msra.mxu1 %v3581_v20  ;;  %2208 = vmatprep.mubr.f32.mxu0 %v4086_v30  ;;  %v2137_v20 = vld [vmem:[#allocation6 + $0x1c8] sm:$0xff] }
 0x635   :  { %2217 = vmatprep.subr.mxu1 %v3584_v25  ;;  %2279 = vmatprep.mubr.f32.mxu1 %v4086_v30  ;;  %v2133_v25 = vld [vmem:[#allocation6 + $0x1a8] sm:$0xff]  ;;  %v2107_v30 = vld [vmem:[#allocation6 + $0xd8] sm:$0xff] }
 0x636   :  { %2218 = vmatpush1.msra.mxu1 %v3587_v28  ;;  %2145 = vmatpush1.msra.mxu0 %v2140_v51  ;;  %v2129_v28 = vld [vmem:[#allocation6 + $0x188] sm:$0xff] }
 0x637   :  { %2219 = vmatprep.subr.mxu1 %v3590_v48  ;;  %2146 = vmatprep.subr.mxu0 %v2137_v20  ;;  %v2128_v48 = vld [vmem:[#allocation6 + $0x180] sm:$0xff]  ;;  %v4094_v51 = vld [vmem:[#allocation56_spill] sm:$0xff] }
 0x638   :  { %2220 = vmatpush1.msra.mxu1 %v3593_v53  ;;  %2147 = vmatpush1.msra.mxu0 %v2136_v54  ;;  %v2125_v53 = vld [vmem:[#allocation6 + $0x168] sm:$0xff] }
 0x639   :  { %2221 = vmatprep.subr.mxu1 %v3596_v11  ;;  %2148 = vmatprep.subr.mxu0 %v2133_v25  ;;  %v2124_v11 = vld [vmem:[#allocation6 + $0x160] sm:$0xff] }
 0x63a   :  { %2222 = vmatpush1.msra.mxu1 %v3599_v42  ;;  %2149 = vmatpush1.msra.mxu0 %v2132_v46  ;;  %v2127_v42 = vld [vmem:[#allocation6 + $0x178] sm:$0xff] }
 0x63b   :  { %2150 = vmatprep.subr.mxu0 %v2129_v28  ;;  %2223 = vmatprep.subr.mxu1 %v2127_v42  ;;  %v4095_v28 = vld [vmem:[#allocation43_spill] sm:$0xff] }
 0x63c   :  { %2151 = vmatpush1.msra.mxu0 %v2128_v48  ;;  %2224 = vmatpush1.msra.mxu1 %v2126_v32 }
 0x63d   :  { %2152 = vmatprep.subr.mxu0 %v2125_v53  ;;  %2225 = vmatprep.subr.mxu1 %v2123_v58  ;;  %v4096_v53 = vld [vmem:[#allocation42_spill] sm:$0xff] }
 0x63e   :  { %2153 = vmatpush1.msra.mxu0 %v2124_v11  ;;  %2226 = vmatpush1.msra.mxu1 %v2122_v60 }
 0x63f   :  { %2154 = vmatprep.subr.mxu0 %v2121_v4  ;;  %2227 = vmatprep.subr.mxu1 %v2119_v62 }
 0x640   :  { %2155 = vmatpush1.msra.mxu0 %v2120_v50  ;;  %2228 = vmatpush1.msra.mxu1 %v2118_v1 }
 0x641   :  { %2156 = vmatprep.subr.mxu0 %v2117_v59  ;;  %2229 = vmatprep.subr.mxu1 %v2115_v16 }
 0x642   :  { %2157 = vmatpush1.msra.mxu0 %v2116_v61  ;;  %2230 = vmatpush1.msra.mxu1 %v2114_v19 }
 0x643   :  { %2158 = vmatprep.subr.mxu0 %v2113_v63  ;;  %2231 = vmatprep.subr.mxu1 %v2111_v23  ;;  %v2338_v23 = vld [vmem:[#allocation8 + $0x70] sm:$0xff] }
 0x644   :  { %2159 = vmatpush1.msra.mxu0 %v2112_v15  ;;  %2232 = vmatpush1.msra.mxu1 %v2110_v26  ;;  %v2337_v26 = vld [vmem:[#allocation8 + $0x68] sm:$0xff] }
 0x645   :  { %2160 = vmatprep.subr.mxu0 %v2109_v17  ;;  %2233 = vmatprep.subr.mxu1 %v2107_v30  ;;  %v2334_v30 = vld [vmem:[#allocation8 + $0x50] sm:$0xff] }
 0x646   :  { %2161 = vmatpush1.msra.mxu0 %v2108_v22  ;;  %2234 = vmatpush1.msra.mxu1 %v2106_v33  ;;  %v2332_v33 = vld [vmem:[#allocation8 + $0x40] sm:$0xff] }
 0x647   :  { %2162 = vmatprep.subr.mxu0 %v2105_v24  ;;  %2235 = vmatprep.subr.mxu1 %v2103_v43  ;;  %v4097_v24 = vld [vmem:[#allocation58_spill] sm:$0xff]  ;;  %v2330_v43 = vld [vmem:[#allocation8 + $0x30] sm:$0xff] }
 0x648   :  { %2163 = vmatpush1.msra.mxu0 %v2104_v29  ;;  %2236 = vmatpush1.msra.mxu1 %v2102_v45  ;;  %v2336_v29 = vld [vmem:[#allocation8 + $0x60] sm:$0xff] }
 0x649   :  { %2164 = vmatprep.subr.mxu0 %v2101_v31  ;;  %2237 = vmatprep.subr.mxu1 %v2099_v3  ;;  %v2333_v31 = vld [vmem:[#allocation8 + $0x48] sm:$0xff]  ;;  %v2328_v45 = vld [vmem:[#allocation8 + $0x20] sm:$0xff]  ;;  %v2326_v3 = vld [vmem:[#allocation8 + $0x10] sm:$0xff] }
 0x64a   :  { %2165 = vmatpush1.msra.mxu0 %v2100_v40  ;;  %2238 = vmatpush1.msra.mxu1 %v2098_v6  ;;  %v2331_v40 = vld [vmem:[#allocation8 + $0x38] sm:$0xff]  ;;  %v2324_v6 = vld [vmem:[#allocation8] sm:$0xff] }
 0x64b   :  { %2166 = vmatprep.subr.mxu0 %v2097_v44  ;;  %2239 = vmatprep.subr.mxu1 %v2095_v8  ;;  %v2329_v44 = vld [vmem:[#allocation8 + $0x28] sm:$0xff] }
 0x64c   :  { %2167 = vmatpush1.msra.mxu0 %v2096_v2  ;;  %2240 = vmatpush1.msra.mxu1 %v2094_v14  ;;  %v2327_v2 = vld [vmem:[#allocation8 + $0x18] sm:$0xff]  ;;  %v4099_v8 = vld [vmem:[#allocation32_spill] sm:$0xff] }
 0x64d   :  { %2168 = vmatprep.subr.mxu0 %v2093_v5  ;;  %2241 = vmatprep.subr.mxu1 %v2091_v21  ;;  %v2325_v5 = vld [vmem:[#allocation8 + $0x8] sm:$0xff]  ;;  %v4102_v21 = vld [vmem:[#allocation11_spill] sm:$0xff] }
 0x64e   :  { %2169 = vmatpush1.msra.mxu0 %v2092_v7  ;;  %2242 = vmatpush1.msra.mxu1 %v2090_v52  ;;  %v4098_v7 = vld [vmem:[#allocation12_spill] sm:$0xff]  ;;  %v4103_v52 = vld [vmem:[#allocation57_spill] sm:$0xff] }
 0x64f   :  { %2170 = vmatprep.subr.mxu0 %v2089_v9  ;;  %2243 = vmatprep.subr.mxu1 %v2087_v55  ;;  %v4100_v9 = vld [vmem:[#allocation35_spill] sm:$0xff] }
 0x650   :  { %2171 = vmatpush1.msra.mxu0 %v2088_v18  ;;  %2244 = vmatpush1.msra.mxu1 %v2086_v10  ;;  %v4101_v18 = vld [vmem:[#allocation45_spill] sm:$0xff] }
 0x651   :  { %2172 = vmatprep.subr.mxu0 %v2085_v27  ;;  %2245 = vmatprep.subr.mxu1 %v2083_v35  ;;  %v243_v27 = vadd.f32 %v4102_v21, %v4101_v18 }
 0x652   :  { %2173 = vmatpush1.msra.mxu0 %v2084_v41  ;;  %2246 = vmatpush1.msra.mxu1 %v2082_v57 }
 0x653   :  { %2174 = vmatprep.subr.mxu0 %v2081_v38 }
 0x654   :  { %2175 = vmatpush1.msra.mxu0 %v2080_v47 }
 0x655   :  { %2523 = vmatprep.subr.mxu0 %v2339_v56 }
 0x6f3   :  { %v1969_v37 = vpop.f32.mrf.mxu0  ;;  %v2040_v54 = vpop.f32.mrf.mxu1 }
 0x6f4   :  { %v2045_v39 = vadd.f32 %v1969_v37, %v4093_v49  ;;  %v2047_v11 = vadd.f32 %v2040_v54, %v4096_v53 }
 0x6f5   :  { %v1971_v0 = vpop.f32.mrf.mxu0  ;;  %v2042_v46 = vpop.f32.mrf.mxu1 }
 0x6f6   :  { %v2493_v12 = vmul.f32 -1.442695, %v2045_v39  ;;  %v2046_v20 = vadd.f32 %v1971_v0, %v4094_v51  ;;  %v2048_v48 = vadd.f32 %v2042_v46, %v4095_v28 }
 0x6f8   :  { %2671 = vpow2.f32 %v2493_v12  ;;  %v2494_v25 = vmul.f32 -1.442695, %v2046_v20  ;;  %v2495_v42 = vmul.f32 -1.442695, %v2048_v48 }
 0x6fa   :  { %2673 = vpow2.f32 %v2494_v25 }
 0x6fb   :  { %2675 = vtanh.f32 %v2047_v11 }
 0x6fc   :  { %2677 = vpow2.f32 %v2495_v42 }
 0x705   :  { %v2672_v4 = vpop.eup %2671 }
 0x706   :  { %v2052_v32 = vadd.f32 1.0, %v2672_v4 }
 0x707   :  { %v2674_v50 = vpop.eup %2673 }
 0x708   :  { %2679 = vrcp.f32 %v2052_v32  ;;  %v2058_v58 = vadd.f32 1.0, %v2674_v50  ;;  %v2676_v59 = vpop.eup %2675 }
 0x709   :  { %v2678_v60 = vpop.eup %2677 }
 0x70a   :  { %2681 = vrcp.f32 %v2058_v58  ;;  %v2065_v1 = vadd.f32 1.0, %v2678_v60 }
 0x70c   :  { %2683 = vrcp.f32 %v2065_v1 }
 0x715   :  { %v2680_v61 = vpop.eup %2679 }
 0x716   :  { %v2069_v62 = vmul.f32 %v2680_v61, %v2676_v59 }
 0x717   :  { %v2682_v63 = vpop.eup %2681 }
 0x718   :  { %v2068_v15 = vmul.f32 %v2682_v63, %v3787_v36  ;;  %v2335_v36 = vld [vmem:[#allocation8 + $0x58] sm:$0xff] }
 0x719   :  { %v2684_v17 = vpop.eup %2683 }
 0x71a   :  { %v3808_v16 = vadd.f32 %v2069_v62, %v2068_v15 }
 0x71c   :  { %2685 = vtanh.f32 %v3808_v16 }
 0x729   :  { %v2686_v19 = vpop.eup %2685 }
 0x72a   :  { %v2072_v22 = vmul.f32 %v2686_v19, %v2684_v17 }
 0x72c   :  { %2209 = vmatmul.mubr.f32.vlgmr.msra.gmra.mxu0 %v2072_v22  ;;  %2280 = vmatmul.mubr.f32.vlgmr.msra.gmra.mxu1 %v2072_v22 }
 0x72d   :  { %2524 = vmatpush3.msra.mxu0 %v2339_v56  ;;  %2555 = vmatprep.mubr.f32.mxu0 %v4097_v24  ;;  %v4104_v56 = vld [vmem:[#allocation46_spill] sm:$0xff] }
 0x72e   :  { %2525 = vmatprep.subr.mxu0 %v2338_v23 }
 0x72f   :  { %2526 = vmatpush3.msra.mxu0 %v2338_v23 }
 0x730   :  { %2527 = vmatprep.subr.mxu0 %v2337_v26 }
 0x731   :  { %2528 = vmatpush3.msra.mxu0 %v2337_v26 }
 0x732   :  { %2529 = vmatprep.subr.mxu0 %v2336_v29 }
 0x733   :  { %2530 = vmatpush3.msra.mxu0 %v2336_v29 }
 0x734   :  { %2531 = vmatprep.subr.mxu0 %v2335_v36 }
 0x735   :  { %2532 = vmatpush3.msra.mxu0 %v2335_v36 }
 0x736   :  { %2533 = vmatprep.subr.mxu0 %v2334_v30 }
 0x737   :  { %2534 = vmatpush3.msra.mxu0 %v2334_v30 }
 0x738   :  { %2535 = vmatprep.subr.mxu0 %v2333_v31 }
 0x739   :  { %2536 = vmatpush3.msra.mxu0 %v2333_v31 }
 0x73a   :  { %2537 = vmatprep.subr.mxu0 %v2332_v33 }
 0x73b   :  { %2538 = vmatpush3.msra.mxu0 %v2332_v33 }
 0x73c   :  { %2539 = vmatprep.subr.mxu0 %v2331_v40 }
 0x73d   :  { %2540 = vmatpush3.msra.mxu0 %v2331_v40 }
 0x73e   :  { %2541 = vmatprep.subr.mxu0 %v2330_v43 }
 0x73f   :  { %2542 = vmatpush3.msra.mxu0 %v2330_v43 }
 0x740   :  { %2543 = vmatprep.subr.mxu0 %v2329_v44 }
 0x741   :  { %2544 = vmatpush3.msra.mxu0 %v2329_v44 }
 0x742   :  { %2545 = vmatprep.subr.mxu0 %v2328_v45 }
 0x743   :  { %2546 = vmatpush3.msra.mxu0 %v2328_v45 }
 0x744   :  { %2547 = vmatprep.subr.mxu0 %v2327_v2 }
 0x745   :  { %2548 = vmatpush3.msra.mxu0 %v2327_v2 }
 0x746   :  { %2549 = vmatprep.subr.mxu0 %v2326_v3 }
 0x747   :  { %2550 = vmatpush3.msra.mxu0 %v2326_v3 }
 0x748   :  { %2551 = vmatprep.subr.mxu0 %v2325_v5 }
 0x749   :  { %2552 = vmatpush3.msra.mxu0 %v2325_v5 }
 0x74a   :  { %2553 = vmatprep.subr.mxu0 %v2324_v6 }
 0x74b   :  { %2554 = vmatpush3.msra.mxu0 %v2324_v6 }
 0x74c   :  { %2556 = vmatmul.mubr.f32.vlgmr.msra.gmra.mxu0 %v4098_v7 }
 0x74d   :  { %2558 = vmatprep.mubr.f32.mxu0 %v4099_v8 }
 0x750   :  { %2559 = vmatmul.mubr.f32.gmra.mxu0 %v4100_v9 }
 0x751   :  { %2561 = vmatprep.mubr.f32.mxu0 %v3713_v13  ;;  %v4105_v13 = vld [vmem:[#allocation44_spill] sm:$0xff] }
 0x754   :  { %2562 = vmatmul.mubr.f32.gmra.mxu0 %v3790_v34 }
 0x755   :  { %2564 = vmatprep.mubr.f32.mxu0 %v2072_v22 }
 0x7ec   :  { %v2210_v14 = vpop.f32.mrf.mxu0  ;;  %v2281_v47 = vpop.f32.mrf.mxu1 }
 0x7ed   :  { %v2286_v41 = vadd.f32 %v2210_v14, %v4103_v52  ;;  %v2288_v49 = vadd.f32 %v2281_v47, %v4105_v13 }
 0x7ee   :  { %v2212_v55 = vpop.f32.mrf.mxu0  ;;  %v2283_v57 = vpop.f32.mrf.mxu1 }
 0x7ef   :  { %v2496_v38 = vmul.f32 -1.442695, %v2286_v41  ;;  %v2287_v10 = vadd.f32 %v2212_v55, %v243_v27  ;;  %v2289_v37 = vadd.f32 %v2283_v57, %v4104_v56 }
 0x7f1   :  { %2687 = vpow2.f32 %v2496_v38  ;;  %v2497_v35 = vmul.f32 -1.442695, %v2287_v10  ;;  %v2498_v34 = vmul.f32 -1.442695, %v2289_v37 }
 0x7f3   :  { %2689 = vpow2.f32 %v2497_v35 }
 0x7f4   :  { %2691 = vtanh.f32 %v2288_v49 }
 0x7f5   :  { %2693 = vpow2.f32 %v2498_v34 }
 0x7fe   :  { %v2688_v39 = vpop.eup %2687 }
 0x7ff   :  { %v2293_v0 = vadd.f32 1.0, %v2688_v39 }
 0x800   :  { %v2690_v12 = vpop.eup %2689 }
 0x801   :  { %2695 = vrcp.f32 %v2293_v0  ;;  %v2299_v51 = vadd.f32 1.0, %v2690_v12  ;;  %v2692_v20 = vpop.eup %2691 }
 0x802   :  { %v2694_v25 = vpop.eup %2693 }
 0x803   :  { %2697 = vrcp.f32 %v2299_v51  ;;  %v2306_v11 = vadd.f32 1.0, %v2694_v25 }
 0x805   :  { %2699 = vrcp.f32 %v2306_v11 }
 0x80c   :  { %v2557_v54 = vpop.f32.mrf.mxu0 }
 0x80d   :  { %2446 = vst [vmem:[%s3852_s5 + $0x8] sm:$0xff] %v2557_v54 }
 0x80e   :  { %v2696_v46 = vpop.eup %2695  ;;  %v2406_v28 = vpop.f32.mrf.mxu0 }
 0x80f   :  { %v2310_v48 = vmul.f32 %v2696_v46, %v2692_v20  ;;  %2445 = vst [vmem:[%s3852_s5] sm:$0xff] %v2406_v28 }
 0x810   :  { %v2698_v53 = vpop.eup %2697  ;;  %v2560_v42 = vpop.f32.mrf.mxu0 }
 0x811   :  { %v2309_v4 = vmul.f32 %v2698_v53, %v3808_v16  ;;  %2448 = vst [vmem:[%s3852_s5 + $0x18] sm:$0xff] %v2560_v42 }
 0x812   :  { %v2416_v32 = vpop.f32.mrf.mxu0  ;;  %v2700_v60 = vpop.eup %2699 }
 0x813   :  { %2447 = vst [vmem:[%s3852_s5 + $0x10] sm:$0xff] %v2416_v32  ;;  %v2311_v50 = vadd.f32 %v2310_v48, %v2309_v4 }
 0x814   :  { %v2563_v58 = vpop.f32.mrf.mxu0 }
 0x815   :  { %2450 = vst [vmem:[%s3852_s5 + $0x28] sm:$0xff] %v2563_v58  ;;  %2701 = vtanh.f32 %v2311_v50 }
 0x816   :  { %v2426_v59 = vpop.f32.mrf.mxu0 }
 0x817   :  { %2449 = vst [vmem:[%s3852_s5 + $0x20] sm:$0xff] %v2426_v59 }
 0x822   :  { %v2702_v61 = vpop.eup %2701 }
 0x823   :  { %v2313_v62 = vmul.f32 %v2702_v61, %v2700_v60 }
 0x825   :  { %2565 = vmatmul.mubr.f32.gmra.mxu0 %v2313_v62 }
 0x8e5   :  { %v2566_v63 = vpop.f32.mrf.mxu0 }
 0x8e6   :  { %2452 = vst [vmem:[%s3852_s5 + $0x38] sm:$0xff] %v2566_v63 }
 0x8e7   :  { %v2436_v1 = vpop.f32.mrf.mxu0 }
 0x8e8   :  { %2451 = vst [vmem:[%s3852_s5 + $0x30] sm:$0xff] %v2436_v1 }
 0x8e9   :  { %2457 = vsyncpa [#allocation5], 1 }
 0x8ea   :  { %2458 = vsyncpa [#allocation7], 1 }

</bundles_post_ra>
